<compile_context>
chip_gen: v6e
topology: v6e:2x2x1
jax: 0.10.0
libtpu: 0.0.40
codegen_flags: <defaults>
</compile_context>

<pallas_src>
import jax
import jax.numpy as jnp
from jax.experimental import pallas as pl
from jax.experimental.pallas import tpu as pltpu

NEG_SLOPE = 0.1


def _leaky_relu(x):
    # leaky_relu(x, 0.1) == max(x, 0.1 * x) since the slope is in (0, 1).
    return jnp.maximum(x, NEG_SLOPE * x)


def down_forward(x, params, *, avgpool=True, extract_latent=True):
    """x: (B, Cin, H, W) NCHW.

    params = (w1, b1, w2, b2[, wlat, blat]) in PyTorch layouts:
      w1: (Cout, Cin, fs, fs)   b1: (Cout,)
      w2: (Cout, Cout, fs, fs)  b2: (Cout,)
      wlat: (L, Cin, H, W)      blat: (L,)   (only if extract_latent)
    """
    w1, b1, w2, b2 = params[:4]

    B, Cin, H, W = x.shape
    Cout, _, fs, fs2 = w1.shape
    assert fs == fs2 and fs % 2 == 1
    p = (fs - 1) // 2
    assert H % 2 == 0 and W % 2 == 0
    Hp, Wp = H // 2, W // 2
    HW, HWp = H * W, Hp * Wp

    if not avgpool:
        # TODO(synk): learned conv pool (kernel=2, stride=2, padding=1) path
        # of `down` is not implemented; only AvgPool2d(2) (the default).
        raise NotImplementedError("avgpool=False not implemented")

    # ---- matmul-ready parameter packing (done ONCE, outside the kernel) ----
    # conv weights -> (Cout, fs*fs*Cin), tap-major ((dy,dx) blocks of Cin),
    # matching the in-kernel im2col concat order.
    w1k = jnp.transpose(w1, (0, 2, 3, 1)).reshape(Cout, fs * fs * Cin)
    w2k = jnp.transpose(w2, (0, 2, 3, 1)).reshape(Cout, fs * fs * Cout)
    b1k = b1.reshape(Cout, 1).astype(jnp.float32)
    b2k = b2.reshape(Cout, 1).astype(jnp.float32)

    # 2x2 average pool as one matmul: pooled[c, :] = x_flat[c, :] @ P,
    # P[(h*W+w), (h//2)*Wp + (w//2)] = 0.25.  O((HW)^2) memory -> fine for
    # small spatial sizes; for large H*W switch to a tiled/strided pool.
    hh = jnp.arange(H)[:, None]
    ww = jnp.arange(W)[None, :]
    col = ((hh // 2) * Wp + (ww // 2)).reshape(HW)
    pool_mat = (col[:, None] == jnp.arange(HWp)[None, :]).astype(jnp.float32) * 0.25

    # Free (contiguous) reshape of NCHW -> (B, Cin, HW); no transposes.
    x2 = x.reshape(B, Cin, HW)

    inputs = [x2, pool_mat, w1k, b1k, w2k, b2k]
    in_specs = [
        pl.BlockSpec((1, Cin, HW), lambda b: (b, 0, 0)),
        pl.BlockSpec((HW, HWp), lambda b: (0, 0)),
        pl.BlockSpec((Cout, fs * fs * Cin), lambda b: (0, 0)),
        pl.BlockSpec((Cout, 1), lambda b: (0, 0)),
        pl.BlockSpec((Cout, fs * fs * Cout), lambda b: (0, 0)),
        pl.BlockSpec((Cout, 1), lambda b: (0, 0)),
    ]

    if extract_latent:
        wlat, blat = params[4], params[5]
        L = wlat.shape[0]
        assert wlat.shape[2] == H and wlat.shape[3] == W, \
            "only spatial_size == input spatial size is supported"
        # TODO(synk): latent_extractor with spatial_size < H (valid conv with
        # multiple output positions) is not implemented; UNet uses a global
        # (1x1-output) latent here.
        xv = x.reshape(B, 1, Cin * HW)                     # free reshape
        wlatk = wlat.reshape(L, Cin * HW).T                # (Cin*HW, L)
        blatk = blat.reshape(1, L).astype(jnp.float32)
        inputs = [xv] + inputs + [wlatk, blatk]
        in_specs = ([pl.BlockSpec((1, 1, Cin * HW), lambda b: (b, 0, 0))]
                    + in_specs
                    + [pl.BlockSpec((Cin * HW, L), lambda b: (0, 0)),
                       pl.BlockSpec((1, L), lambda b: (0, 0))])
        out_shape = (jax.ShapeDtypeStruct((B, Cout, HWp), x.dtype),
                     jax.ShapeDtypeStruct((B, 1, L), x.dtype))
        out_specs = (pl.BlockSpec((1, Cout, HWp), lambda b: (b, 0, 0)),
                     pl.BlockSpec((1, 1, L), lambda b: (b, 0, 0)))
    else:
        out_shape = jax.ShapeDtypeStruct((B, Cout, HWp), x.dtype)
        out_specs = pl.BlockSpec((1, Cout, HWp), lambda b: (b, 0, 0))

    def kernel(*refs):
        if extract_latent:
            (xv_ref, x2_ref, pm_ref, w1_ref, b1_ref, w2_ref, b2_ref,
             wl_ref, bl_ref, out_ref, lat_ref, pad1, pad2) = refs
        else:
            (x2_ref, pm_ref, w1_ref, b1_ref, w2_ref, b2_ref,
             out_ref, pad1, pad2) = refs

        # ---- latent extractor: full-spatial conv == one tiny matmul ----
        if extract_latent:
            lat = jnp.dot(xv_ref[0].astype(jnp.float32), wl_ref[...],
                          preferred_element_type=jnp.float32) + bl_ref[...]
            lat_ref[0] = lat.astype(lat_ref.dtype)

        # ---- 2x2 average pool as a single MXU matmul (spatial on lanes) ----
        pooled = jnp.dot(x2_ref[0].astype(jnp.float32), pm_ref[...],
                         preferred_element_type=jnp.float32)       # (Cin, HpWp)

        # ---- fs x fs "same" conv as ONE fused matmul over all taps ----
        def conv_same(h, cpad_ref, w_ref, b_ref):
            C = h.shape[0]
            # zero-padded spatial buffer in VMEM scratch
            cpad_ref[...] = jnp.zeros(cpad_ref.shape, cpad_ref.dtype)
            cpad_ref[:, p:p + Hp, p:p + Wp] = h.reshape(C, Hp, Wp)
            # gather the fs*fs shifted taps and stack along the K axis
            taps = [cpad_ref[:, dy:dy + Hp, dx:dx + Wp]
                    for dy in range(fs) for dx in range(fs)]
            cols = jnp.concatenate(taps, axis=0).reshape(fs * fs * C, Hp * Wp)
            return jnp.dot(w_ref[...], cols,
                           preferred_element_type=jnp.float32) + b_ref[...]

        h1 = _leaky_relu(conv_same(pooled, pad1, w1_ref, b1_ref))  # (Cout, HpWp)
        h2 = _leaky_relu(conv_same(h1, pad2, w2_ref, b2_ref))      # (Cout, HpWp)
        out_ref[0] = h2.astype(out_ref.dtype)

    outs = pl.pallas_call(
        kernel,
        out_shape=out_shape,
        grid_spec=pltpu.PrefetchScalarGridSpec(
            num_scalar_prefetch=0,
            grid=(B,),
            in_specs=in_specs,
            out_specs=out_specs,
            scratch_shapes=[
                pltpu.VMEM((Cin, Hp + 2 * p, Wp + 2 * p), jnp.float32),
                pltpu.VMEM((Cout, Hp + 2 * p, Wp + 2 * p), jnp.float32),
            ]),
        compiler_params=pltpu.CompilerParams(
            dimension_semantics=("parallel",)),
    )(*inputs)

    if extract_latent:
        out2, lat2 = outs
        return out2.reshape(B, Cout, Hp, Wp), lat2.reshape(B, -1, 1, 1)
    return outs.reshape(B, Cout, Hp, Wp)


def reference_down(x, params, *, extract_latent=True):
    """Pure-JAX reference mirroring the PyTorch `down.forward`."""
    w1, b1, w2, b2 = params[:4]
    dn = ("NCHW", "OIHW", "NCHW")
    latent = None
    if extract_latent:
        wlat, blat = params[4], params[5]
        latent = jax.lax.conv_general_dilated(x, wlat, (1, 1), "VALID",
                                              dimension_numbers=dn)
        latent = latent + blat[None, :, None, None]
    B, C, H, W = x.shape
    xp = x.reshape(B, C, H // 2, 2, W // 2, 2).mean(axis=(3, 5))   # AvgPool2d(2)
    p = (w1.shape[2] - 1) // 2
    y = jax.lax.conv_general_dilated(xp, w1, (1, 1), [(p, p), (p, p)],
                                     dimension_numbers=dn) + b1[None, :, None, None]
    y = jnp.where(y >= 0, y, NEG_SLOPE * y)
    y = jax.lax.conv_general_dilated(y, w2, (1, 1), [(p, p), (p, p)],
                                     dimension_numbers=dn) + b2[None, :, None, None]
    y = jnp.where(y >= 0, y, NEG_SLOPE * y)
    return (y, latent) if extract_latent else y


if __name__ == "__main__":
    B, Cin, Cout, H, W = 2, 4, 8, 16, 16
    fs, latent_dim = 3, 4

    key = jax.random.PRNGKey(0)
    kx, k1, k2, k3, k4, k5, k6 = jax.random.split(key, 7)
    x = jax.random.normal(kx, (B, Cin, H, W), jnp.float32)
    w1 = jax.random.normal(k1, (Cout, Cin, fs, fs), jnp.float32) * 0.2
    b1 = jax.random.normal(k2, (Cout,), jnp.float32) * 0.1
    w2 = jax.random.normal(k3, (Cout, Cout, fs, fs), jnp.float32) * 0.2
    b2 = jax.random.normal(k4, (Cout,), jnp.float32) * 0.1
    wlat = jax.random.normal(k5, (latent_dim, Cin, H, W), jnp.float32) * 0.05
    blat = jax.random.normal(k6, (latent_dim,), jnp.float32) * 0.1
    params = (w1, b1, w2, b2, wlat, blat)

    out, lat = down_forward(x, params, avgpool=True, extract_latent=True)
    out = jax.block_until_ready(out)
    lat = jax.block_until_ready(lat)

    ref_out, ref_lat = reference_down(x, params, extract_latent=True)
    assert out.shape == (B, Cout, H // 2, W // 2)
    assert lat.shape == (B, latent_dim, 1, 1)
    assert jnp.allclose(out, ref_out, atol=2e-4, rtol=2e-4), "conv path mismatch"
    assert jnp.allclose(lat, ref_lat, atol=2e-4, rtol=2e-4), "latent mismatch"

    print("KERNEL_OK")
</pallas_src>

<mosaic_0001>
module attributes {stable_mosaic.version = 11 : i64} {
  func.func @kernel(%arg0: i32, %arg1: memref<1x1x1024xf32, #tpu.memory_space<vmem>>, %arg2: memref<1x4x256xf32, #tpu.memory_space<vmem>>, %arg3: memref<256x64xf32, #tpu.memory_space<vmem>>, %arg4: memref<8x36xf32, #tpu.memory_space<vmem>>, %arg5: memref<8x1xf32, #tpu.memory_space<vmem>>, %arg6: memref<8x72xf32, #tpu.memory_space<vmem>>, %arg7: memref<8x1xf32, #tpu.memory_space<vmem>>, %arg8: memref<1024x4xf32, #tpu.memory_space<vmem>>, %arg9: memref<1x4xf32, #tpu.memory_space<vmem>>, %arg10: memref<1x8x64xf32, #tpu.memory_space<vmem>>, %arg11: memref<1x1x4xf32, #tpu.memory_space<vmem>>, %arg12: memref<4x10x10xf32, #tpu.memory_space<vmem>>, %arg13: memref<8x10x10xf32, #tpu.memory_space<vmem>>) attributes {dimension_semantics = [#tpu.dimension_semantics<parallel>], iteration_bounds = array<i64: 2>, scalar_prefetch = 0 : i64, scratch_operands = 2 : i64, tpu.core_type = #tpu.core_type<tc>, window_params = [{transform_indices = @transform_0, window_bounds = array<i64: 1, 1, 1024>}, {transform_indices = @transform_1, window_bounds = array<i64: 1, 4, 256>}, {pipeline_mode = #tpu.pipeline_mode<synchronous>, transform_indices = @transform_2, window_bounds = array<i64: 256, 64>}, {pipeline_mode = #tpu.pipeline_mode<synchronous>, transform_indices = @transform_3, window_bounds = array<i64: 8, 36>}, {pipeline_mode = #tpu.pipeline_mode<synchronous>, transform_indices = @transform_4, window_bounds = array<i64: 8, 1>}, {pipeline_mode = #tpu.pipeline_mode<synchronous>, transform_indices = @transform_5, window_bounds = array<i64: 8, 72>}, {pipeline_mode = #tpu.pipeline_mode<synchronous>, transform_indices = @transform_6, window_bounds = array<i64: 8, 1>}, {pipeline_mode = #tpu.pipeline_mode<synchronous>, transform_indices = @transform_7, window_bounds = array<i64: 1024, 4>}, {pipeline_mode = #tpu.pipeline_mode<synchronous>, transform_indices = @transform_8, window_bounds = array<i64: 1, 4>}, {transform_indices = @transform_9, window_bounds = array<i64: 1, 8, 64>}, {transform_indices = @transform_10, window_bounds = array<i64: 1, 1, 4>}]} {
    %c0 = arith.constant 0 : index
    %c0_0 = arith.constant 0 : index
    %c0_1 = arith.constant 0 : index
    %0 = vector.load %arg1[%c0, %c0_0, %c0_1] : memref<1x1x1024xf32, #tpu.memory_space<vmem>>, vector<1x1x1024xf32>
    %1 = vector.shape_cast %0 : vector<1x1x1024xf32> to vector<1x1024xf32>
    %c0_2 = arith.constant 0 : index
    %c0_3 = arith.constant 0 : index
    %2 = vector.load %arg8[%c0_2, %c0_3] : memref<1024x4xf32, #tpu.memory_space<vmem>>, vector<1024x4xf32>
    %cst = arith.constant dense<0.000000e+00> : vector<1x4xf32>
    %3 = tpu.matmul %1, %2, %cst {dimension_numbers = #tpu.dot_dimension_numbers<[1], [0], [0], [1], [0, 0, 1, 1], [], []>} : vector<1x1024xf32>, vector<1024x4xf32>, vector<1x4xf32> -> vector<1x4xf32>
    %c0_4 = arith.constant 0 : index
    %c0_5 = arith.constant 0 : index
    %4 = vector.load %arg9[%c0_4, %c0_5] : memref<1x4xf32, #tpu.memory_space<vmem>>, vector<1x4xf32>
    %5 = arith.addf %3, %4 : vector<1x4xf32>
    %c0_6 = arith.constant 0 : index
    %c0_7 = arith.constant 0 : index
    %c0_8 = arith.constant 0 : index
    %6 = vector.load %arg11[%c0_6, %c0_7, %c0_8] : memref<1x1x4xf32, #tpu.memory_space<vmem>>, vector<1x1x4xf32>
    %7 = vector.shape_cast %6 : vector<1x1x4xf32> to vector<1x4xf32>
    %8 = vector.shape_cast %5 : vector<1x4xf32> to vector<1x1x4xf32>
    tpu.vector_store %arg11[%c0_6, %c0_7, %c0_8], %8 {strides = array<i32>} : memref<1x1x4xf32, #tpu.memory_space<vmem>>, vector<1x1x4xf32>,
    %c0_9 = arith.constant 0 : index
    %c0_10 = arith.constant 0 : index
    %c0_11 = arith.constant 0 : index
    %9 = vector.load %arg2[%c0_9, %c0_10, %c0_11] : memref<1x4x256xf32, #tpu.memory_space<vmem>>, vector<1x4x256xf32>
    %10 = vector.shape_cast %9 : vector<1x4x256xf32> to vector<4x256xf32>
    %c0_12 = arith.constant 0 : index
    %c0_13 = arith.constant 0 : index
    %11 = vector.load %arg3[%c0_12, %c0_13] : memref<256x64xf32, #tpu.memory_space<vmem>>, vector<256x64xf32>
    %cst_14 = arith.constant dense<0.000000e+00> : vector<4x64xf32>
    %12 = tpu.matmul %10, %11, %cst_14 {dimension_numbers = #tpu.dot_dimension_numbers<[1], [0], [0], [1], [0, 0, 1, 1], [], []>} : vector<4x256xf32>, vector<256x64xf32>, vector<4x64xf32> -> vector<4x64xf32>
    %cst_15 = arith.constant 0.000000e+00 : f32
    %13 = vector.broadcast %cst_15 : f32 to vector<4x10x10xf32>
    %c0_16 = arith.constant 0 : index
    %c0_17 = arith.constant 0 : index
    %c0_18 = arith.constant 0 : index
    %14 = vector.load %arg12[%c0_16, %c0_17, %c0_18] : memref<4x10x10xf32, #tpu.memory_space<vmem>>, vector<4x10x10xf32>
    tpu.vector_store %arg12[%c0_16, %c0_17, %c0_18], %13 {strides = array<i32>} : memref<4x10x10xf32, #tpu.memory_space<vmem>>, vector<4x10x10xf32>,
    %15 = vector.shape_cast %12 : vector<4x64xf32> to vector<4x8x8xf32>
    %c0_19 = arith.constant 0 : index
    %c1 = arith.constant 1 : index
    %c1_20 = arith.constant 1 : index
    %16 = vector.load %arg12[%c0_19, %c1, %c1_20] : memref<4x10x10xf32, #tpu.memory_space<vmem>>, vector<4x8x8xf32>
    tpu.vector_store %arg12[%c0_19, %c1, %c1_20], %15 {strides = array<i32>} : memref<4x10x10xf32, #tpu.memory_space<vmem>>, vector<4x8x8xf32>,
    %c0_21 = arith.constant 0 : index
    %c0_22 = arith.constant 0 : index
    %c0_23 = arith.constant 0 : index
    %17 = vector.load %arg12[%c0_21, %c0_22, %c0_23] : memref<4x10x10xf32, #tpu.memory_space<vmem>>, vector<4x8x8xf32>
    %c0_24 = arith.constant 0 : index
    %c0_25 = arith.constant 0 : index
    %c1_26 = arith.constant 1 : index
    %18 = vector.load %arg12[%c0_24, %c0_25, %c1_26] : memref<4x10x10xf32, #tpu.memory_space<vmem>>, vector<4x8x8xf32>
    %c0_27 = arith.constant 0 : index
    %c0_28 = arith.constant 0 : index
    %c2 = arith.constant 2 : index
    %19 = vector.load %arg12[%c0_27, %c0_28, %c2] : memref<4x10x10xf32, #tpu.memory_space<vmem>>, vector<4x8x8xf32>
    %c0_29 = arith.constant 0 : index
    %c1_30 = arith.constant 1 : index
    %c0_31 = arith.constant 0 : index
    %20 = vector.load %arg12[%c0_29, %c1_30, %c0_31] : memref<4x10x10xf32, #tpu.memory_space<vmem>>, vector<4x8x8xf32>
    %c0_32 = arith.constant 0 : index
    %c1_33 = arith.constant 1 : index
    %c1_34 = arith.constant 1 : index
    %21 = vector.load %arg12[%c0_32, %c1_33, %c1_34] : memref<4x10x10xf32, #tpu.memory_space<vmem>>, vector<4x8x8xf32>
    %c0_35 = arith.constant 0 : index
    %c1_36 = arith.constant 1 : index
    %c2_37 = arith.constant 2 : index
    %22 = vector.load %arg12[%c0_35, %c1_36, %c2_37] : memref<4x10x10xf32, #tpu.memory_space<vmem>>, vector<4x8x8xf32>
    %c0_38 = arith.constant 0 : index
    %c2_39 = arith.constant 2 : index
    %c0_40 = arith.constant 0 : index
    %23 = vector.load %arg12[%c0_38, %c2_39, %c0_40] : memref<4x10x10xf32, #tpu.memory_space<vmem>>, vector<4x8x8xf32>
    %c0_41 = arith.constant 0 : index
    %c2_42 = arith.constant 2 : index
    %c1_43 = arith.constant 1 : index
    %24 = vector.load %arg12[%c0_41, %c2_42, %c1_43] : memref<4x10x10xf32, #tpu.memory_space<vmem>>, vector<4x8x8xf32>
    %c0_44 = arith.constant 0 : index
    %c2_45 = arith.constant 2 : index
    %c2_46 = arith.constant 2 : index
    %25 = vector.load %arg12[%c0_44, %c2_45, %c2_46] : memref<4x10x10xf32, #tpu.memory_space<vmem>>, vector<4x8x8xf32>
    %26 = tpu.concatenate %17, %18, %19, %20, %21, %22, %23, %24, %25 in 0 : vector<4x8x8xf32>, vector<4x8x8xf32>, vector<4x8x8xf32>, vector<4x8x8xf32>, vector<4x8x8xf32>, vector<4x8x8xf32>, vector<4x8x8xf32>, vector<4x8x8xf32>, vector<4x8x8xf32> -> vector<36x8x8xf32>
    %27 = vector.shape_cast %26 : vector<36x8x8xf32> to vector<36x64xf32>
    %c0_47 = arith.constant 0 : index
    %c0_48 = arith.constant 0 : index
    %28 = vector.load %arg4[%c0_47, %c0_48] : memref<8x36xf32, #tpu.memory_space<vmem>>, vector<8x36xf32>
    %cst_49 = arith.constant dense<0.000000e+00> : vector<8x64xf32>
    %29 = tpu.matmul %28, %27, %cst_49 {dimension_numbers = #tpu.dot_dimension_numbers<[1], [0], [0], [1], [0, 0, 1, 1], [], []>} : vector<8x36xf32>, vector<36x64xf32>, vector<8x64xf32> -> vector<8x64xf32>
    %c0_50 = arith.constant 0 : index
    %c0_51 = arith.constant 0 : index
    %30 = vector.load %arg5[%c0_50, %c0_51] : memref<8x1xf32, #tpu.memory_space<vmem>>, vector<8x1xf32>
    %31 = vector.broadcast %30 : vector<8x1xf32> to vector<8x64xf32>
    %32 = arith.addf %29, %31 : vector<8x64xf32>
    %cst_52 = arith.constant 1.000000e-01 : f32
    %33 = vector.broadcast %cst_52 : f32 to vector<8x64xf32>
    %34 = arith.mulf %33, %32 : vector<8x64xf32>
    %35 = arith.maximumf %32, %34 : vector<8x64xf32>
    %cst_53 = arith.constant 0.000000e+00 : f32
    %36 = vector.broadcast %cst_53 : f32 to vector<8x10x10xf32>
    %c0_54 = arith.constant 0 : index
    %c0_55 = arith.constant 0 : index
    %c0_56 = arith.constant 0 : index
    %37 = vector.load %arg13[%c0_54, %c0_55, %c0_56] : memref<8x10x10xf32, #tpu.memory_space<vmem>>, vector<8x10x10xf32>
    tpu.vector_store %arg13[%c0_54, %c0_55, %c0_56], %36 {strides = array<i32>} : memref<8x10x10xf32, #tpu.memory_space<vmem>>, vector<8x10x10xf32>,
    %38 = vector.shape_cast %35 : vector<8x64xf32> to vector<8x8x8xf32>
    %c0_57 = arith.constant 0 : index
    %c1_58 = arith.constant 1 : index
    %c1_59 = arith.constant 1 : index
    %39 = vector.load %arg13[%c0_57, %c1_58, %c1_59] : memref<8x10x10xf32, #tpu.memory_space<vmem>>, vector<8x8x8xf32>
    tpu.vector_store %arg13[%c0_57, %c1_58, %c1_59], %38 {strides = array<i32>} : memref<8x10x10xf32, #tpu.memory_space<vmem>>, vector<8x8x8xf32>,
    %c0_60 = arith.constant 0 : index
    %c0_61 = arith.constant 0 : index
    %c0_62 = arith.constant 0 : index
    %40 = vector.load %arg13[%c0_60, %c0_61, %c0_62] : memref<8x10x10xf32, #tpu.memory_space<vmem>>, vector<8x8x8xf32>
    %c0_63 = arith.constant 0 : index
    %c0_64 = arith.constant 0 : index
    %c1_65 = arith.constant 1 : index
    %41 = vector.load %arg13[%c0_63, %c0_64, %c1_65] : memref<8x10x10xf32, #tpu.memory_space<vmem>>, vector<8x8x8xf32>
    %c0_66 = arith.constant 0 : index
    %c0_67 = arith.constant 0 : index
    %c2_68 = arith.constant 2 : index
    %42 = vector.load %arg13[%c0_66, %c0_67, %c2_68] : memref<8x10x10xf32, #tpu.memory_space<vmem>>, vector<8x8x8xf32>
    %c0_69 = arith.constant 0 : index
    %c1_70 = arith.constant 1 : index
    %c0_71 = arith.constant 0 : index
    %43 = vector.load %arg13[%c0_69, %c1_70, %c0_71] : memref<8x10x10xf32, #tpu.memory_space<vmem>>, vector<8x8x8xf32>
    %c0_72 = arith.constant 0 : index
    %c1_73 = arith.constant 1 : index
    %c1_74 = arith.constant 1 : index
    %44 = vector.load %arg13[%c0_72, %c1_73, %c1_74] : memref<8x10x10xf32, #tpu.memory_space<vmem>>, vector<8x8x8xf32>
    %c0_75 = arith.constant 0 : index
    %c1_76 = arith.constant 1 : index
    %c2_77 = arith.constant 2 : index
    %45 = vector.load %arg13[%c0_75, %c1_76, %c2_77] : memref<8x10x10xf32, #tpu.memory_space<vmem>>, vector<8x8x8xf32>
    %c0_78 = arith.constant 0 : index
    %c2_79 = arith.constant 2 : index
    %c0_80 = arith.constant 0 : index
    %46 = vector.load %arg13[%c0_78, %c2_79, %c0_80] : memref<8x10x10xf32, #tpu.memory_space<vmem>>, vector<8x8x8xf32>
    %c0_81 = arith.constant 0 : index
    %c2_82 = arith.constant 2 : index
    %c1_83 = arith.constant 1 : index
    %47 = vector.load %arg13[%c0_81, %c2_82, %c1_83] : memref<8x10x10xf32, #tpu.memory_space<vmem>>, vector<8x8x8xf32>
    %c0_84 = arith.constant 0 : index
    %c2_85 = arith.constant 2 : index
    %c2_86 = arith.constant 2 : index
    %48 = vector.load %arg13[%c0_84, %c2_85, %c2_86] : memref<8x10x10xf32, #tpu.memory_space<vmem>>, vector<8x8x8xf32>
    %49 = tpu.concatenate %40, %41, %42, %43, %44, %45, %46, %47, %48 in 0 : vector<8x8x8xf32>, vector<8x8x8xf32>, vector<8x8x8xf32>, vector<8x8x8xf32>, vector<8x8x8xf32>, vector<8x8x8xf32>, vector<8x8x8xf32>, vector<8x8x8xf32>, vector<8x8x8xf32> -> vector<72x8x8xf32>
    %50 = vector.shape_cast %49 : vector<72x8x8xf32> to vector<72x64xf32>
    %c0_87 = arith.constant 0 : index
    %c0_88 = arith.constant 0 : index
    %51 = vector.load %arg6[%c0_87, %c0_88] : memref<8x72xf32, #tpu.memory_space<vmem>>, vector<8x72xf32>
    %cst_89 = arith.constant dense<0.000000e+00> : vector<8x64xf32>
    %52 = tpu.matmul %51, %50, %cst_89 {dimension_numbers = #tpu.dot_dimension_numbers<[1], [0], [0], [1], [0, 0, 1, 1], [], []>} : vector<8x72xf32>, vector<72x64xf32>, vector<8x64xf32> -> vector<8x64xf32>
    %c0_90 = arith.constant 0 : index
    %c0_91 = arith.constant 0 : index
    %53 = vector.load %arg7[%c0_90, %c0_91] : memref<8x1xf32, #tpu.memory_space<vmem>>, vector<8x1xf32>
    %54 = vector.broadcast %53 : vector<8x1xf32> to vector<8x64xf32>
    %55 = arith.addf %52, %54 : vector<8x64xf32>
    %cst_92 = arith.constant 1.000000e-01 : f32
    %56 = vector.broadcast %cst_92 : f32 to vector<8x64xf32>
    %57 = arith.mulf %56, %55 : vector<8x64xf32>
    %58 = arith.maximumf %55, %57 : vector<8x64xf32>
    %c0_93 = arith.constant 0 : index
    %c0_94 = arith.constant 0 : index
    %c0_95 = arith.constant 0 : index
    %59 = vector.load %arg10[%c0_93, %c0_94, %c0_95] : memref<1x8x64xf32, #tpu.memory_space<vmem>>, vector<1x8x64xf32>
    %60 = vector.shape_cast %59 : vector<1x8x64xf32> to vector<8x64xf32>
    %61 = vector.shape_cast %58 : vector<8x64xf32> to vector<1x8x64xf32>
    tpu.vector_store %arg10[%c0_93, %c0_94, %c0_95], %61 {strides = array<i32>} : memref<1x8x64xf32, #tpu.memory_space<vmem>>, vector<1x8x64xf32>,
    return
  }
  func.func @transform_0(%arg0: i32) -> (i32, i32, i32) {
    %c0_i32 = arith.constant 0 : i32
    %c0_i32_0 = arith.constant 0 : i32
    %c0_i32_1 = arith.constant 0 : i32
    return %arg0, %c0_i32, %c0_i32_0 : i32, i32, i32
  }
  func.func @transform_1(%arg0: i32) -> (i32, i32, i32) {
    %c0_i32 = arith.constant 0 : i32
    %c0_i32_0 = arith.constant 0 : i32
    %c0_i32_1 = arith.constant 0 : i32
    return %arg0, %c0_i32, %c0_i32_0 : i32, i32, i32
  }
  func.func @transform_2(%arg0: i32) -> (i32, i32) {
    %c0_i32 = arith.constant 0 : i32
    %c0_i32_0 = arith.constant 0 : i32
    %c0_i32_1 = arith.constant 0 : i32
    return %c0_i32, %c0_i32_0 : i32, i32
  }
  func.func @transform_3(%arg0: i32) -> (i32, i32) {
    %c0_i32 = arith.constant 0 : i32
    %c0_i32_0 = arith.constant 0 : i32
    %c0_i32_1 = arith.constant 0 : i32
    return %c0_i32, %c0_i32_0 : i32, i32
  }
  func.func @transform_4(%arg0: i32) -> (i32, i32) {
    %c0_i32 = arith.constant 0 : i32
    %c0_i32_0 = arith.constant 0 : i32
    %c0_i32_1 = arith.constant 0 : i32
    return %c0_i32, %c0_i32_0 : i32, i32
  }
  func.func @transform_5(%arg0: i32) -> (i32, i32) {
    %c0_i32 = arith.constant 0 : i32
    %c0_i32_0 = arith.constant 0 : i32
    %c0_i32_1 = arith.constant 0 : i32
    return %c0_i32, %c0_i32_0 : i32, i32
  }
  func.func @transform_6(%arg0: i32) -> (i32, i32) {
    %c0_i32 = arith.constant 0 : i32
    %c0_i32_0 = arith.constant 0 : i32
    %c0_i32_1 = arith.constant 0 : i32
    return %c0_i32, %c0_i32_0 : i32, i32
  }
  func.func @transform_7(%arg0: i32) -> (i32, i32) {
    %c0_i32 = arith.constant 0 : i32
    %c0_i32_0 = arith.constant 0 : i32
    %c0_i32_1 = arith.constant 0 : i32
    return %c0_i32, %c0_i32_0 : i32, i32
  }
  func.func @transform_8(%arg0: i32) -> (i32, i32) {
    %c0_i32 = arith.constant 0 : i32
    %c0_i32_0 = arith.constant 0 : i32
    %c0_i32_1 = arith.constant 0 : i32
    return %c0_i32, %c0_i32_0 : i32, i32
  }
  func.func @transform_9(%arg0: i32) -> (i32, i32, i32) {
    %c0_i32 = arith.constant 0 : i32
    %c0_i32_0 = arith.constant 0 : i32
    %c0_i32_1 = arith.constant 0 : i32
    return %arg0, %c0_i32, %c0_i32_0 : i32, i32, i32
  }
  func.func @transform_10(%arg0: i32) -> (i32, i32, i32) {
    %c0_i32 = arith.constant 0 : i32
    %c0_i32_0 = arith.constant 0 : i32
    %c0_i32_1 = arith.constant 0 : i32
    return %arg0, %c0_i32, %c0_i32_0 : i32, i32, i32
  }
}

</mosaic_0001>

<bundles_post_ra>
// kernel: tpu_custom_call.1
= control target key start
LH: loop header
LB: loop body
LE: loop exit
PB: predicated region body
PF: predicated region fallthrough
CT: control target
= control target key end

     0   :  { %s6655_s0 = inlined_call_operand.vmem [shape: f32[2,1,1024], index: 0, kind: input, shape index: {}]   ;;  %s6656_s1 = inlined_call_operand.vmem [shape: f32[2,4,256], index: 1, kind: input, shape index: {}]   ;;  %s6657_s2 = inlined_call_operand.vmem [shape: f32[256,64], index: 2, kind: input, shape index: {}]   ;;  %s6658_s3 = inlined_call_operand.vmem [shape: f32[8,36], index: 3, kind: input, shape index: {}]   ;;  %s6659_s4 = inlined_call_operand.vmem [shape: f32[8,1], index: 4, kind: input, shape index: {}]   ;;  %s6660_s5 = inlined_call_operand.vmem [shape: f32[8,72], index: 5, kind: input, shape index: {}]   ;;  %s6661_s6 = inlined_call_operand.vmem [shape: f32[8,1], index: 6, kind: input, shape index: {}]   ;;  %s6662_s7 = inlined_call_operand.vmem [shape: f32[1024,4], index: 7, kind: input, shape index: {}]   ;;  %s6663_s8 = inlined_call_operand.vmem [shape: f32[1,4], index: 8, kind: input, shape index: {}]   ;;  %s6664_s9 = inlined_call_operand.hbm [shape: f32[2,8,64], index: 9, kind: output, shape index: {0}]   ;;  %s6665_s10 = inlined_call_operand.hbm [shape: f32[2,1,4], index: 10, kind: output, shape index: {1}]  }
   0x1   :  { %6680 = sst [smem:[#allocation12_spill]] %s6655_s0 }
   0x2   :  { %16 = vsyncpa [#allocation5], 0 }
   0x3   :  { %18 = vsyncpa [#allocation5 + $0x1], 0 }
   0x4   :  { %19 = vsyncpa [#allocation7], 0 }
   0x5   :  { %21 = vsyncpa [#allocation7 + $0x1], 0  ;;  %s4683_s13 = smov 0   ;;  %s4685_s14 = smov 0  }
   0x6   :  { %s4687_s15 = smov 0   ;;  %s4689_s16 = smov 0  }
   0x7 LB: > { %6681 = sst [smem:[#allocation10_spill]] %s4598_s15  ;;  %s4704_s17 = sadd.s32 4294967295, %s4602_s16   ;;  %s4602_s16 = sphi %s4689_s16, %s6700_s16   ;;  %s4598_s15 = sphi %s4687_s15, %s6697_s15   ;;  %s4594_s14 = sphi %s4685_s14, %s6699_s14   ;;  %s4590_s13 = sphi %s4683_s13, %s6698_s13  }
   0x8   : > { %s4202_s18 = sadd.s32 4294967294, %s4602_s16   ;;  %s4708_s19 = sadd.s32 1, %s4602_s16  }
   0x9   : > { %s233_s20 = sadd.s32 1, %s4598_s15  ;;  %s230_s21 = ssub.s32 %s4602_s16, %s4708_s19 }
   0xa   : > { %p243_p0 = scmp.ne.s32.totalorder %s4598_s15, %s4594_s14  ;;  %p231_p1 = scmp.eq.s32.totalorder %s230_s21, 0 }
   0xb   : > { %p244_p2 = scmp.eq.s32.totalorder %s4704_s17, 1  ;;  %p249_p3 = scmp.ne.s32.totalorder %s4594_s14, %s4590_s13 }
   0xc   : > { %p250_p4 = scmp.eq.s32.totalorder %s4202_s18, 1  ;;  %p4205_p7 = scmp.ge.s32.totalorder %s4602_s16, 1 }
   0xd   : > { %s4719_s22 = scalar_select %p231_p1, %s4598_s15, %s233_s20  }
   0xe   : > { %p4721_p5 = por %p244_p2, %p243_p0  ;;  %p4725_p6 = por %p250_p4, %p249_p3 }
   0xf   : > { %6682 = sst [smem:[#allocation11_spill]] %s4719_s22  ;;  %p330_p8 = scmp.lt.s32.totalorder %s4602_s16, 3 }
  0x11   : > { %p331_p9 = pnand %p4205_p7, %p330_p8 }
  0x12   : > { %p376_p10 = scmp.lt.s32.totalorder (!%p331_p9), %s4704_s17, 1  ;;  %s6685_s0 = sld [smem:[#allocation12_spill]] (!%p331_p9) }
  0x13   : > { %334 = sbr.rel (%p331_p9) target bundleno = 1941 (0x795), region = 56  ;;  %s5257_s15 = sand.u32 (!%p331_p9), 1, %s4594_s14  }
  0x14   : > { %s6667_s29 = scalar_lea.vmem (!%p331_p9), [#allocation6], %s5257_s15  ;;  %s4604_s30 = smov (!%p331_p9), 104  }
  0x15   : > { %s6675_s11 = smov (!%p331_p9), 96   ;;  %s4607_s18 = smov (!%p331_p9), 112  }
  0x16   : > { %s4609_s20 = smov (!%p331_p9), 88   ;;  %s6672_s21 = smov (!%p331_p9), 1  }
  0x17   : > { %s6668_s22 = smov (!%p331_p9), 127   ;;  %s4617_s26 = smov (!%p331_p9), 16  }
  0x18   : > { %v417_v0 = vld [vmem:[%s6662_s7 + $0xf8] sm:$0xff]  ;;  %v416_v2 = vld [vmem:[%s6662_s7 + $0xf0] sm:$0xff]  ;;  %v415_v6 = vld [vmem:[%s6662_s7 + $0xe8] sm:$0xff]  ;;  %s4834_s25 = scalar_select %p376_p10, %s4704_s17, 1  ;;  %v516_v35 = vlaneseq  ;;  %vm836_vm0 = vcmask 24576   ;;  %vm944_vm1 = vcmask 80896  }
  0x19   : > { %v401_v1 = vld [vmem:[%s6662_s7 + $0x78] sm:$0xff]  ;;  %4219 = vmatprep.subr.mxu0 %v417_v0  ;;  %v400_v4 = vld [vmem:[%s6662_s7 + $0x70] sm:$0xff]  ;;  %v399_v8 = vld [vmem:[%s6662_s7 + $0x68] sm:$0xff]  ;;  %vm946_vm2 = vcmask 74752   ;;  %vm1060_vm3 = vcmask 72712   ;;  %vm4624_vm4 = vmmov 0  }
  0x1a   : > { %v449_v3 = vld [vmem:[%s6662_s7 + $0x1f8] sm:$0xff]  ;;  %4220 = vmatpush3.msra.mxu0 %v401_v1  ;;  %v448_v7 = vld [vmem:[%s6662_s7 + $0x1f0] sm:$0xff]  ;;  %v447_v10 = vld [vmem:[%s6662_s7 + $0x1e8] sm:$0xff]  ;;  %s4207_s12 = sshll.u32 %s4834_s25, 3  ;;  %v4867_v44 = vshrl.u32 %v516_v35, 7  ;;  %s6674_s25 = smov 80  }
  0x1b   : > { %v433_v5 = vld [vmem:[%s6662_s7 + $0x178] sm:$0xff]  ;;  %4254 = vmatprep.subr.mxu1 %v449_v3  ;;  %4221 = vmatprep.subr.mxu0 %v416_v2  ;;  %v432_v9 = vld [vmem:[%s6662_s7 + $0x170] sm:$0xff]  ;;  %v414_v11 = vld [vmem:[%s6662_s7 + $0xe0] sm:$0xff]  ;;  %s379_s27 = scalar_lea.vmem %s6685_s0, %s4207_s12  ;;  %s384_s28 = scalar_lea.vmem %s6656_s1, %s4207_s12  ;;  %vm1913_vm5 = vcmask 64512   ;;  %vm1919_vm6 = vcmask 130048   ;;  %vm1925_vm7 = vcmask 195584  }
  0x1c   : > { %4255 = vmatpush3.msra.mxu1 %v433_v5  ;;  %4222 = vmatpush3.msra.mxu0 %v400_v4  ;;  %v431_v12 = vld [vmem:[%s6662_s7 + $0x168] sm:$0xff]  ;;  %v398_v13 = vld [vmem:[%s6662_s7 + $0x60] sm:$0xff]  ;;  %v413_v15 = vld [vmem:[%s6662_s7 + $0xd8] sm:$0xff]  ;;  %v522_v53 = vsub.s32 1, %v4867_v44  ;;  %v518_v59 = vsub.s32 0, %v4867_v44  ;;  %v530_v1 = vsub.s32 3, %v4867_v44 }
  0x1d   : > { %4256 = vmatprep.subr.mxu1 %v448_v7  ;;  %4223 = vmatprep.subr.mxu0 %v415_v6  ;;  %v446_v14 = vld [vmem:[%s6662_s7 + $0x1e0] sm:$0xff]  ;;  %v397_v17 = vld [vmem:[%s6662_s7 + $0x58] sm:$0xff]  ;;  %v412_v19 = vld [vmem:[%s6662_s7 + $0xd0] sm:$0xff]  ;;  %v526_v3 = vsub.s32 2, %v4867_v44  ;;  %s4610_s12 = smov 72   ;;  %vm1931_vm8 = vcmask 261120  }
  0x1e   : > { %4257 = vmatpush3.msra.mxu1 %v432_v9  ;;  %4224 = vmatpush3.msra.mxu0 %v399_v8  ;;  %v430_v16 = vld [vmem:[%s6662_s7 + $0x160] sm:$0xff]  ;;  %v445_v18 = vld [vmem:[%s6662_s7 + $0x1d8] sm:$0xff]  ;;  %v396_v21 = vld [vmem:[%s6662_s7 + $0x50] sm:$0xff]  ;;  %vm1937_vm9 = vcmask 326656   ;;  %vm1943_vm10 = vcmask 392192   ;;  %vm1949_vm11 = vcmask 457728  }
  0x1f   : > { %4258 = vmatprep.subr.mxu1 %v447_v10  ;;  %4225 = vmatprep.subr.mxu0 %v414_v11  ;;  %v429_v20 = vld [vmem:[%s6662_s7 + $0x158] sm:$0xff]  ;;  %v444_v22 = vld [vmem:[%s6662_s7 + $0x1d0] sm:$0xff]  ;;  %v411_v23 = vld [vmem:[%s6662_s7 + $0xc8] sm:$0xff]  ;;  %vm1966_vm12 = vcmask 1043456   ;;  %vm1962_vm13 = vcmask 293888   ;;  %vm3994_vm14 = vcmask 588800  }
  0x20   : > { %4259 = vmatpush3.msra.mxu1 %v431_v12  ;;  %4226 = vmatpush3.msra.mxu0 %v398_v13  ;;  %v428_v24 = vld [vmem:[%s6662_s7 + $0x150] sm:$0xff]  ;;  %v395_v25 = vld [vmem:[%s6662_s7 + $0x48] sm:$0xff]  ;;  %v410_v27 = vld [vmem:[%s6662_s7 + $0xc0] sm:$0xff] }
  0x21   : > { %4260 = vmatprep.subr.mxu1 %v446_v14  ;;  %4227 = vmatprep.subr.mxu0 %v413_v15  ;;  %v443_v26 = vld [vmem:[%s6662_s7 + $0x1c8] sm:$0xff]  ;;  %v394_v29 = vld [vmem:[%s6662_s7 + $0x40] sm:$0xff]  ;;  %v409_v31 = vld [vmem:[%s6662_s7 + $0xb8] sm:$0xff] }
  0x22   : > { %4261 = vmatpush3.msra.mxu1 %v430_v16  ;;  %4228 = vmatpush3.msra.mxu0 %v397_v17  ;;  %v427_v28 = vld [vmem:[%s6662_s7 + $0x148] sm:$0xff]  ;;  %v442_v30 = vld [vmem:[%s6662_s7 + $0x1c0] sm:$0xff]  ;;  %v393_v33 = vld [vmem:[%s6662_s7 + $0x38] sm:$0xff] }
  0x23   : > { %4262 = vmatprep.subr.mxu1 %v445_v18  ;;  %4229 = vmatprep.subr.mxu0 %v412_v19  ;;  %v426_v32 = vld [vmem:[%s6662_s7 + $0x140] sm:$0xff]  ;;  %v441_v34 = vld [vmem:[%s6662_s7 + $0x1b8] sm:$0xff]  ;;  %v408_v36 = vld [vmem:[%s6662_s7 + $0xb0] sm:$0xff] }
  0x24   : > { %4263 = vmatpush3.msra.mxu1 %v429_v20  ;;  %4230 = vmatpush3.msra.mxu0 %v396_v21  ;;  %v425_v37 = vld [vmem:[%s6662_s7 + $0x138] sm:$0xff]  ;;  %v392_v38 = vld [vmem:[%s6662_s7 + $0x30] sm:$0xff]  ;;  %v407_v40 = vld [vmem:[%s6662_s7 + $0xa8] sm:$0xff] }
  0x25   : > { %4264 = vmatprep.subr.mxu1 %v444_v22  ;;  %4231 = vmatprep.subr.mxu0 %v411_v23  ;;  %v440_v39 = vld [vmem:[%s6662_s7 + $0x1b0] sm:$0xff]  ;;  %v391_v42 = vld [vmem:[%s6662_s7 + $0x28] sm:$0xff]  ;;  %v406_v45 = vld [vmem:[%s6662_s7 + $0xa0] sm:$0xff] }
  0x26   : > { %4265 = vmatpush3.msra.mxu1 %v428_v24  ;;  %4232 = vmatpush3.msra.mxu0 %v395_v25  ;;  %v424_v41 = vld [vmem:[%s6662_s7 + $0x130] sm:$0xff]  ;;  %v439_v43 = vld [vmem:[%s6662_s7 + $0x1a8] sm:$0xff]  ;;  %v390_v47 = vld [vmem:[%s6662_s7 + $0x20] sm:$0xff] }
  0x27   : > { %4266 = vmatprep.subr.mxu1 %v443_v26  ;;  %4233 = vmatprep.subr.mxu0 %v410_v27  ;;  %v423_v46 = vld [vmem:[%s6662_s7 + $0x128] sm:$0xff]  ;;  %v438_v48 = vld [vmem:[%s6662_s7 + $0x1a0] sm:$0xff]  ;;  %v405_v49 = vld [vmem:[%s6662_s7 + $0x98] sm:$0xff] }
  0x28   : > { %4267 = vmatpush3.msra.mxu1 %v427_v28  ;;  %4234 = vmatpush3.msra.mxu0 %v394_v29  ;;  %v422_v50 = vld [vmem:[%s6662_s7 + $0x120] sm:$0xff]  ;;  %v389_v51 = vld [vmem:[%s6662_s7 + $0x18] sm:$0xff]  ;;  %v404_v54 = vld [vmem:[%s6662_s7 + $0x90] sm:$0xff] }
  0x29   : > { %4268 = vmatprep.subr.mxu1 %v442_v30  ;;  %4235 = vmatprep.subr.mxu0 %v409_v31  ;;  %v437_v52 = vld [vmem:[%s6662_s7 + $0x198] sm:$0xff]  ;;  %v4905_v56 = vld [vmem:[%s379_s27] sm:$0xff]  ;;  %v388_v57 = vld [vmem:[%s6662_s7 + $0x10] sm:$0xff]  ;;  %s6670_s27 = smov 126  }
  0x2a   : > { %4269 = vmatpush3.msra.mxu1 %v426_v32  ;;  %4236 = vmatpush3.msra.mxu0 %v393_v33  ;;  %v421_v55 = vld [vmem:[%s6662_s7 + $0x118] sm:$0xff]  ;;  %v436_v58 = vld [vmem:[%s6662_s7 + $0x190] sm:$0xff]  ;;  %v403_v60 = vld [vmem:[%s6662_s7 + $0x88] sm:$0xff]  ;;  %v523_v0 = vrot.slane %v4905_v56, %v522_v53  ;;  %v519_v6 = vrot.slane %v4905_v56, %v518_v59  ;;  %v531_v10 = vrot.slane %v4905_v56, %v530_v1 }
  0x2b   : > { %4270 = vmatprep.subr.mxu1 %v441_v34  ;;  %4237 = vmatprep.subr.mxu0 %v408_v36  ;;  %v420_v61 = vld [vmem:[%s6662_s7 + $0x110] sm:$0xff]  ;;  %v387_v62 = vld [vmem:[%s6662_s7 + $0x8] sm:$0xff]  ;;  %v402_v2 = vld [vmem:[%s6662_s7 + $0x80] sm:$0xff]  ;;  %v527_v12 = vrot.slane %v4905_v56, %v526_v3 }
  0x2c   : > { %4271 = vmatpush3.msra.mxu1 %v425_v37  ;;  %4238 = vmatpush3.msra.mxu0 %v392_v38  ;;  %v435_v63 = vld [vmem:[%s6662_s7 + $0x188] sm:$0xff]  ;;  %v386_v4 = vld [vmem:[%s6662_s7] sm:$0xff]  ;;  %v481_v8 = vld [vmem:[%s6662_s7 + $0x2f8] sm:$0xff] }
  0x2d   : > { %4272 = vmatprep.subr.mxu1 %v440_v39  ;;  %4239 = vmatprep.subr.mxu0 %v407_v40  ;;  %v419_v5 = vld [vmem:[%s6662_s7 + $0x108] sm:$0xff]  ;;  %v434_v7 = vld [vmem:[%s6662_s7 + $0x180] sm:$0xff]  ;;  %v465_v11 = vld [vmem:[%s6662_s7 + $0x278] sm:$0xff] }
  0x2e   : > { %4273 = vmatpush3.msra.mxu1 %v424_v41  ;;  %4240 = vmatpush3.msra.mxu0 %v391_v42  ;;  %v418_v9 = vld [vmem:[%s6662_s7 + $0x100] sm:$0xff]  ;;  %v480_v13 = vld [vmem:[%s6662_s7 + $0x2f0] sm:$0xff]  ;;  %v513_v14 = vld [vmem:[%s6662_s7 + $0x3f8] sm:$0xff] }
  0x2f   : > { %4274 = vmatprep.subr.mxu1 %v439_v43  ;;  %4241 = vmatprep.subr.mxu0 %v406_v45  ;;  %v464_v15 = vld [vmem:[%s6662_s7 + $0x270] sm:$0xff]  ;;  %v497_v16 = vld [vmem:[%s6662_s7 + $0x378] sm:$0xff]  ;;  %v479_v17 = vld [vmem:[%s6662_s7 + $0x2e8] sm:$0xff] }
  0x30   : > { %4275 = vmatpush3.msra.mxu1 %v423_v46  ;;  %4242 = vmatpush3.msra.mxu0 %v390_v47  ;;  %v512_v18 = vld [vmem:[%s6662_s7 + $0x3f0] sm:$0xff]  ;;  %v463_v19 = vld [vmem:[%s6662_s7 + $0x268] sm:$0xff]  ;;  %v478_v21 = vld [vmem:[%s6662_s7 + $0x2e0] sm:$0xff] }
  0x31   : > { %4276 = vmatprep.subr.mxu1 %v438_v48  ;;  %4243 = vmatprep.subr.mxu0 %v405_v49  ;;  %v496_v20 = vld [vmem:[%s6662_s7 + $0x370] sm:$0xff]  ;;  %v511_v22 = vld [vmem:[%s6662_s7 + $0x3e8] sm:$0xff]  ;;  %v462_v23 = vld [vmem:[%s6662_s7 + $0x260] sm:$0xff] }
  0x32   : > { %4277 = vmatpush3.msra.mxu1 %v422_v50  ;;  %4244 = vmatpush3.msra.mxu0 %v389_v51  ;;  %v495_v24 = vld [vmem:[%s6662_s7 + $0x368] sm:$0xff]  ;;  %v477_v25 = vld [vmem:[%s6662_s7 + $0x2d8] sm:$0xff]  ;;  %v510_v26 = vld [vmem:[%s6662_s7 + $0x3e0] sm:$0xff] }
  0x33   : > { %4278 = vmatprep.subr.mxu1 %v437_v52  ;;  %4245 = vmatprep.subr.mxu0 %v404_v54  ;;  %v461_v27 = vld [vmem:[%s6662_s7 + $0x258] sm:$0xff]  ;;  %v494_v28 = vld [vmem:[%s6662_s7 + $0x360] sm:$0xff]  ;;  %v476_v29 = vld [vmem:[%s6662_s7 + $0x2d0] sm:$0xff] }
  0x34   : > { %4279 = vmatpush3.msra.mxu1 %v421_v55  ;;  %4246 = vmatpush3.msra.mxu0 %v388_v57  ;;  %v509_v30 = vld [vmem:[%s6662_s7 + $0x3d8] sm:$0xff]  ;;  %v460_v31 = vld [vmem:[%s6662_s7 + $0x250] sm:$0xff]  ;;  %v475_v33 = vld [vmem:[%s6662_s7 + $0x2c8] sm:$0xff] }
  0x35   : > { %4280 = vmatprep.subr.mxu1 %v436_v58  ;;  %4247 = vmatprep.subr.mxu0 %v403_v60  ;;  %v493_v32 = vld [vmem:[%s6662_s7 + $0x358] sm:$0xff]  ;;  %v508_v34 = vld [vmem:[%s6662_s7 + $0x3d0] sm:$0xff]  ;;  %v459_v35 = vld [vmem:[%s6662_s7 + $0x248] sm:$0xff] }
  0x36   : > { %4281 = vmatpush3.msra.mxu1 %v420_v61  ;;  %4248 = vmatpush3.msra.mxu0 %v387_v62  ;;  %v492_v36 = vld [vmem:[%s6662_s7 + $0x350] sm:$0xff]  ;;  %v474_v37 = vld [vmem:[%s6662_s7 + $0x2c0] sm:$0xff]  ;;  %v507_v38 = vld [vmem:[%s6662_s7 + $0x3c8] sm:$0xff] }
  0x37   : > { %4282 = vmatprep.subr.mxu1 %v435_v63  ;;  %4249 = vmatprep.subr.mxu0 %v402_v2  ;;  %v458_v39 = vld [vmem:[%s6662_s7 + $0x240] sm:$0xff]  ;;  %v491_v40 = vld [vmem:[%s6662_s7 + $0x348] sm:$0xff]  ;;  %v473_v41 = vld [vmem:[%s6662_s7 + $0x2b8] sm:$0xff]  ;;  %v538_v2 = vsub.s32 5, %v4867_v44 }
  0x38   : > { %620 = vmatprep.mubr.f32.mxu0 %v523_v0  ;;  %4250 = vmatpush3.msra.mxu0 %v386_v4  ;;  %v506_v42 = vld [vmem:[%s6662_s7 + $0x3c0] sm:$0xff]  ;;  %v457_v43 = vld [vmem:[%s6662_s7 + $0x238] sm:$0xff]  ;;  %v472_v46 = vld [vmem:[%s6662_s7 + $0x2b0] sm:$0xff] }
  0x39   : > { %4283 = vmatpush3.msra.mxu1 %v419_v5  ;;  %621 = vmatmul.mubr.f32.vlgmr.msra.gmra.mxu0 %v519_v6  ;;  %v490_v45 = vld [vmem:[%s6662_s7 + $0x340] sm:$0xff]  ;;  %v505_v47 = vld [vmem:[%s6662_s7 + $0x3b8] sm:$0xff]  ;;  %v456_v48 = vld [vmem:[%s6662_s7 + $0x230] sm:$0xff]  ;;  %v534_v5 = vsub.s32 4, %v4867_v44 }
  0x3a   : > { %4284 = vmatprep.subr.mxu1 %v434_v7  ;;  %4289 = vmatprep.subr.mxu0 %v481_v8  ;;  %v489_v49 = vld [vmem:[%s6662_s7 + $0x338] sm:$0xff]  ;;  %v471_v50 = vld [vmem:[%s6662_s7 + $0x2a8] sm:$0xff]  ;;  %v504_v51 = vld [vmem:[%s6662_s7 + $0x3b0] sm:$0xff] }
  0x3b   : > { %4285 = vmatpush3.msra.mxu1 %v418_v9  ;;  %690 = vmatprep.mubr.f32.mxu1 %v531_v10  ;;  %v455_v52 = vld [vmem:[%s6662_s7 + $0x228] sm:$0xff]  ;;  %v488_v53 = vld [vmem:[%s6662_s7 + $0x330] sm:$0xff]  ;;  %v470_v54 = vld [vmem:[%s6662_s7 + $0x2a0] sm:$0xff]  ;;  %v546_v10 = vsub.s32 7, %v4867_v44 }
  0x3c   : > { %4290 = vmatpush3.msra.mxu0 %v465_v11  ;;  %691 = vmatmul.mubr.f32.vlgmr.msra.gmra.mxu1 %v527_v12  ;;  %v503_v55 = vld [vmem:[%s6662_s7 + $0x3a8] sm:$0xff]  ;;  %v454_v57 = vld [vmem:[%s6662_s7 + $0x220] sm:$0xff]  ;;  %v469_v59 = vld [vmem:[%s6662_s7 + $0x298] sm:$0xff] }
  0x3d   : > { %4291 = vmatprep.subr.mxu0 %v480_v13  ;;  %4324 = vmatprep.subr.mxu1 %v513_v14  ;;  %v487_v58 = vld [vmem:[%s6662_s7 + $0x328] sm:$0xff]  ;;  %v502_v60 = vld [vmem:[%s6662_s7 + $0x3a0] sm:$0xff]  ;;  %v453_v61 = vld [vmem:[%s6662_s7 + $0x218] sm:$0xff]  ;;  %v539_v13 = vrot.slane %v4905_v56, %v538_v2  ;;  %v542_v14 = vsub.s32 6, %v4867_v44 }
  0x3e   : > { %4292 = vmatpush3.msra.mxu0 %v464_v15  ;;  %4325 = vmatpush3.msra.mxu1 %v497_v16  ;;  %v486_v62 = vld [vmem:[%s6662_s7 + $0x320] sm:$0xff]  ;;  %v468_v63 = vld [vmem:[%s6662_s7 + $0x290] sm:$0xff]  ;;  %v501_v0 = vld [vmem:[%s6662_s7 + $0x398] sm:$0xff]  ;;  %v535_v16 = vrot.slane %v4905_v56, %v534_v5 }
  0x3f   : > { %4293 = vmatprep.subr.mxu0 %v479_v17  ;;  %4326 = vmatprep.subr.mxu1 %v512_v18  ;;  %v452_v1 = vld [vmem:[%s6662_s7 + $0x210] sm:$0xff]  ;;  %v485_v3 = vld [vmem:[%s6662_s7 + $0x318] sm:$0xff]  ;;  %v467_v4 = vld [vmem:[%s6662_s7 + $0x288] sm:$0xff] }
  0x40   : > { %4294 = vmatpush3.msra.mxu0 %v463_v19  ;;  %4327 = vmatpush3.msra.mxu1 %v496_v20  ;;  %v500_v6 = vld [vmem:[%s6662_s7 + $0x390] sm:$0xff]  ;;  %v451_v7 = vld [vmem:[%s6662_s7 + $0x208] sm:$0xff]  ;;  %v466_v9 = vld [vmem:[%s6662_s7 + $0x280] sm:$0xff] }
  0x41   : > { %4295 = vmatprep.subr.mxu0 %v478_v21  ;;  %4328 = vmatprep.subr.mxu1 %v511_v22  ;;  %v484_v8 = vld [vmem:[%s6662_s7 + $0x310] sm:$0xff]  ;;  %v499_v11 = vld [vmem:[%s6662_s7 + $0x388] sm:$0xff]  ;;  %v450_v12 = vld [vmem:[%s6662_s7 + $0x200] sm:$0xff]  ;;  %v547_v21 = vrot.slane %v4905_v56, %v546_v10 }
  0x42   : > { %4296 = vmatpush3.msra.mxu0 %v462_v23  ;;  %4329 = vmatpush3.msra.mxu1 %v495_v24  ;;  %v483_v15 = vld [vmem:[%s6662_s7 + $0x308] sm:$0xff]  ;;  %v498_v17 = vld [vmem:[%s6662_s7 + $0x380] sm:$0xff]  ;;  %v870_v19 = vld [vmem:[%s6657_s2 + $0xf8] sm:$0xff]  ;;  %v543_v23 = vrot.slane %v4905_v56, %v542_v14 }
  0x43   : > { %4297 = vmatprep.subr.mxu0 %v477_v25  ;;  %4330 = vmatprep.subr.mxu1 %v510_v26  ;;  %v5147_v18 = vld [vmem:[%s384_s28] sm:$0xff]  ;;  %v854_v22 = vld [vmem:[%s6657_s2 + $0x78] sm:$0xff]  ;;  %v869_v24 = vld [vmem:[%s6657_s2 + $0xf0] sm:$0xff]  ;;  %s4605_s28 = smov 120  }
  0x44   : > { %4298 = vmatpush3.msra.mxu0 %v461_v27  ;;  %4331 = vmatpush3.msra.mxu1 %v494_v28  ;;  %v482_v20 = vld [vmem:[%s6662_s7 + $0x300] sm:$0xff]  ;;  %v872_v25 = vcombine.high %v5147_v18, %v5147_v18  ;;  %v853_v26 = vld [vmem:[%s6657_s2 + $0x70] sm:$0xff]  ;;  %v868_v56 = vld [vmem:[%s6657_s2 + $0xe8] sm:$0xff] }
  0x45   : > { %4299 = vmatprep.subr.mxu0 %v476_v29  ;;  %4332 = vmatprep.subr.mxu1 %v509_v30  ;;  %v852_v27 = vld [vmem:[%s6657_s2 + $0x68] sm:$0xff]  ;;  %v867_v28 = vld [vmem:[%s6657_s2 + $0xe0] sm:$0xff]  ;;  %v866_v30 = vld [vmem:[%s6657_s2 + $0xd8] sm:$0xff] }
  0x46   : > { %4300 = vmatpush3.msra.mxu0 %v460_v31  ;;  %4333 = vmatpush3.msra.mxu1 %v493_v32  ;;  %v851_v29 = vld [vmem:[%s6657_s2 + $0x60] sm:$0xff]  ;;  %v850_v31 = vld [vmem:[%s6657_s2 + $0x58] sm:$0xff]  ;;  %v865_v32 = vld [vmem:[%s6657_s2 + $0xd0] sm:$0xff] }
  0x47   : > { %4301 = vmatprep.subr.mxu0 %v475_v33  ;;  %4334 = vmatprep.subr.mxu1 %v508_v34  ;;  %v849_v33 = vld [vmem:[%s6657_s2 + $0x50] sm:$0xff]  ;;  %v864_v34 = vld [vmem:[%s6657_s2 + $0xc8] sm:$0xff] }
  0x48   : > { %4302 = vmatpush3.msra.mxu0 %v459_v35  ;;  %4335 = vmatpush3.msra.mxu1 %v492_v36  ;;  %v848_v35 = vld [vmem:[%s6657_s2 + $0x48] sm:$0xff]  ;;  %v863_v36 = vld [vmem:[%s6657_s2 + $0xc0] sm:$0xff] }
  0x49   : > { %4303 = vmatprep.subr.mxu0 %v474_v37  ;;  %4336 = vmatprep.subr.mxu1 %v507_v38  ;;  %v847_v37 = vld [vmem:[%s6657_s2 + $0x40] sm:$0xff]  ;;  %v862_v38 = vld [vmem:[%s6657_s2 + $0xb8] sm:$0xff] }
  0x4a   : > { %4304 = vmatpush3.msra.mxu0 %v458_v39  ;;  %4337 = vmatpush3.msra.mxu1 %v491_v40  ;;  %v846_v39 = vld [vmem:[%s6657_s2 + $0x38] sm:$0xff]  ;;  %v861_v40 = vld [vmem:[%s6657_s2 + $0xb0] sm:$0xff] }
  0x4b   : > { %4305 = vmatprep.subr.mxu0 %v473_v41  ;;  %4338 = vmatprep.subr.mxu1 %v506_v42  ;;  %v845_v41 = vld [vmem:[%s6657_s2 + $0x30] sm:$0xff]  ;;  %v860_v42 = vld [vmem:[%s6657_s2 + $0xa8] sm:$0xff] }
  0x4c   : > { %4306 = vmatpush3.msra.mxu0 %v457_v43  ;;  %4339 = vmatpush3.msra.mxu1 %v490_v45  ;;  %v844_v43 = vld [vmem:[%s6657_s2 + $0x28] sm:$0xff]  ;;  %v859_v45 = vld [vmem:[%s6657_s2 + $0xa0] sm:$0xff] }
  0x4d   : > { %4307 = vmatprep.subr.mxu0 %v472_v46  ;;  %4340 = vmatprep.subr.mxu1 %v505_v47  ;;  %v843_v46 = vld [vmem:[%s6657_s2 + $0x20] sm:$0xff]  ;;  %v858_v47 = vld [vmem:[%s6657_s2 + $0x98] sm:$0xff] }
  0x4e   : > { %4308 = vmatpush3.msra.mxu0 %v456_v48  ;;  %4341 = vmatpush3.msra.mxu1 %v489_v49  ;;  %v842_v48 = vld [vmem:[%s6657_s2 + $0x18] sm:$0xff]  ;;  %v857_v49 = vld [vmem:[%s6657_s2 + $0x90] sm:$0xff] }
  0x4f   : > { %4309 = vmatprep.subr.mxu0 %v471_v50  ;;  %4342 = vmatprep.subr.mxu1 %v504_v51  ;;  %v841_v50 = vld [vmem:[%s6657_s2 + $0x10] sm:$0xff]  ;;  %v856_v51 = vld [vmem:[%s6657_s2 + $0x88] sm:$0xff] }
  0x50   : > { %4310 = vmatpush3.msra.mxu0 %v455_v52  ;;  %4343 = vmatpush3.msra.mxu1 %v488_v53  ;;  %v840_v52 = vld [vmem:[%s6657_s2 + $0x8] sm:$0xff]  ;;  %v855_v53 = vld [vmem:[%s6657_s2 + $0x80] sm:$0xff] }
  0x51   : > { %4311 = vmatprep.subr.mxu0 %v470_v54  ;;  %4344 = vmatprep.subr.mxu1 %v503_v55  ;;  %v839_v54 = vld [vmem:[%s6657_s2] sm:$0xff] }
  0x52   : > { %4312 = vmatpush3.msra.mxu0 %v454_v57  ;;  %4345 = vmatpush3.msra.mxu1 %v487_v58 }
  0x53   : > { %4313 = vmatprep.subr.mxu0 %v469_v59  ;;  %4346 = vmatprep.subr.mxu1 %v502_v60  ;;  %v514_v60 = vld [vmem:[%s6663_s8] sm:$0x1] }
  0x54   : > { %4314 = vmatpush3.msra.mxu0 %v453_v61  ;;  %4347 = vmatpush3.msra.mxu1 %v486_v62 }
  0x55   : > { %4315 = vmatprep.subr.mxu0 %v468_v63  ;;  %4348 = vmatprep.subr.mxu1 %v501_v0 }
  0x56   : > { %4316 = vmatpush3.msra.mxu0 %v452_v1  ;;  %4349 = vmatpush3.msra.mxu1 %v485_v3 }
  0x57   : > { %4317 = vmatprep.subr.mxu0 %v467_v4  ;;  %4350 = vmatprep.subr.mxu1 %v500_v6 }
  0x58   : > { %4318 = vmatpush3.msra.mxu0 %v451_v7  ;;  %4351 = vmatpush3.msra.mxu1 %v484_v8 }
  0x59   : > { %4319 = vmatprep.subr.mxu0 %v466_v9  ;;  %4352 = vmatprep.subr.mxu1 %v499_v11 }
  0x5a   : > { %4320 = vmatpush3.msra.mxu0 %v450_v12  ;;  %760 = vmatprep.mubr.f32.mxu0 %v539_v13  ;;  %v4611_v12 = vmov 0.0  }
  0x5b   : > { %4353 = vmatpush3.msra.mxu1 %v483_v15  ;;  %761 = vmatmul.mubr.f32.vlgmr.msra.gmra.mxu0 %v535_v16  ;;  %948 = vst.msk [vmem:[#allocation2 + $0x10] sm:$0xff] %vm944_vm1, %v4611_v12  ;;  %945 = vst.msk [vmem:[#allocation2] sm:$0xff] %vm944_vm1, %v4611_v12  ;;  %v4612_v15 = vmov 1983009808  }
  0x5c   : > { %4354 = vmatprep.subr.mxu1 %v498_v17  ;;  %4359 = vmatprep.subr.mxu0 %v870_v19  ;;  %949 = vst.msk [vmem:[#allocation2 + $0x18] sm:$0x3] %vm946_vm2, %v4611_v12  ;;  %947 = vst.msk [vmem:[#allocation2 + $0x8] sm:$0x3] %vm946_vm2, %v4611_v12  ;;  %v978_v16 = vunpack.c.l.s4 %v4612_v15 }
  0x5d   : > { %4355 = vmatpush3.msra.mxu1 %v482_v20  ;;  %830 = vmatprep.mubr.f32.mxu1 %v547_v21  ;;  %950 = vst.msk [vmem:[#allocation2 + $0x20] sm:$0xff] %vm944_vm1, %v4611_v12  ;;  %952 = vst.msk [vmem:[#allocation2 + $0x30] sm:$0xff] %vm944_vm1, %v4611_v12  ;;  %v4613_v20 = vmov 1934713408  }
  0x5e   : > { %4360 = vmatpush3.msra.mxu0 %v854_v22  ;;  %831 = vmatmul.mubr.f32.vlgmr.msra.gmra.mxu1 %v543_v23  ;;  %951 = vst.msk [vmem:[#allocation2 + $0x28] sm:$0x3] %vm946_vm2, %v4611_v12  ;;  %953 = vst.msk [vmem:[#allocation2 + $0x38] sm:$0x3] %vm946_vm2, %v4611_v12  ;;  %v979_v19 = vunpack.c.0.s8 %v978_v16  ;;  %v1011_v21 = vunpack.c.l.s4 %v4613_v20 }
  0x5f   : > { %4361 = vmatprep.subr.mxu0 %v869_v24  ;;  %938 = vmatprep.mubr.f32.mxu0 %v872_v25  ;;  %2042 = vst.msk [vmem:[#allocation3] sm:$0xff] %vm944_vm1, %v4611_v12  ;;  %2044 = vst.msk [vmem:[#allocation3 + $0x10] sm:$0xff] %vm944_vm1, %v4611_v12 }
  0x60   : > { %4362 = vmatpush3.msra.mxu0 %v853_v26  ;;  %2043 = vst.msk [vmem:[#allocation3 + $0x8] sm:$0x3] %vm946_vm2, %v4611_v12  ;;  %2045 = vst.msk [vmem:[#allocation3 + $0x18] sm:$0x3] %vm946_vm2, %v4611_v12  ;;  %4410 = vmatprep.subr.mxu1 %v4611_v12  ;;  %v5319_v25 = vsub.s32 %v979_v19, %v4867_v44 }
  0x61   : > { %4363 = vmatprep.subr.mxu0 %v868_v56  ;;  %2046 = vst.msk [vmem:[#allocation3 + $0x20] sm:$0xff] %vm944_vm1, %v4611_v12  ;;  %2048 = vst.msk [vmem:[#allocation3 + $0x30] sm:$0xff] %vm944_vm1, %v4611_v12  ;;  %v1012_v56 = vunpack.c.0.s8 %v1011_v21  ;;  %4420 = vmatprep.mubr.msk.f32.mxu1 %vm4624_vm4, %v4611_v12 }
  0x62   : > { %4364 = vmatpush3.msra.mxu0 %v852_v27  ;;  %2047 = vst.msk [vmem:[#allocation3 + $0x28] sm:$0x3] %vm946_vm2, %v4611_v12  ;;  %2049 = vst.msk [vmem:[#allocation3 + $0x38] sm:$0x3] %vm946_vm2, %v4611_v12 }
  0x63   : > { %4365 = vmatprep.subr.mxu0 %v867_v28  ;;  %2050 = vst.msk [vmem:[#allocation3 + $0x40] sm:$0xff] %vm944_vm1, %v4611_v12  ;;  %2052 = vst.msk [vmem:[#allocation3 + $0x50] sm:$0xff] %vm944_vm1, %v4611_v12 }
  0x64   : > { %4366 = vmatpush3.msra.mxu0 %v851_v29  ;;  %2051 = vst.msk [vmem:[#allocation3 + $0x48] sm:$0x3] %vm946_vm2, %v4611_v12  ;;  %2053 = vst.msk [vmem:[#allocation3 + $0x58] sm:$0x3] %vm946_vm2, %v4611_v12 }
  0x65   : > { %4367 = vmatprep.subr.mxu0 %v866_v30  ;;  %2054 = vst.msk [vmem:[#allocation3 + $0x60] sm:$0xff] %vm944_vm1, %v4611_v12  ;;  %2056 = vst.msk [vmem:[#allocation3 + $0x70] sm:$0xff] %vm944_vm1, %v4611_v12 }
  0x66   : > { %4368 = vmatpush3.msra.mxu0 %v850_v31  ;;  %2055 = vst.msk [vmem:[#allocation3 + $0x68] sm:$0x3] %vm946_vm2, %v4611_v12  ;;  %2057 = vst.msk [vmem:[#allocation3 + $0x78] sm:$0x3] %vm946_vm2, %v4611_v12 }
  0x67   : > { %4369 = vmatprep.subr.mxu0 %v865_v32  ;;  %v5324_v32 = vsub.s32 %v1012_v56, %v4867_v44 }
  0x68   : > { %4370 = vmatpush3.msra.mxu0 %v849_v33 }
  0x69   : > { %4371 = vmatprep.subr.mxu0 %v864_v34 }
  0x6a   : > { %4372 = vmatpush3.msra.mxu0 %v848_v35 }
  0x6b   : > { %4373 = vmatprep.subr.mxu0 %v863_v36 }
  0x6c   : > { %4374 = vmatpush3.msra.mxu0 %v847_v37 }
  0x6d   : > { %4375 = vmatprep.subr.mxu0 %v862_v38 }
  0x6e   : > { %4376 = vmatpush3.msra.mxu0 %v846_v39 }
  0x6f   : > { %4377 = vmatprep.subr.mxu0 %v861_v40 }
  0x70   : > { %4378 = vmatpush3.msra.mxu0 %v845_v41 }
  0x71   : > { %4379 = vmatprep.subr.mxu0 %v860_v42 }
  0x72   : > { %4380 = vmatpush3.msra.mxu0 %v844_v43 }
  0x73   : > { %4381 = vmatprep.subr.mxu0 %v859_v45 }
  0x74   : > { %4382 = vmatpush3.msra.mxu0 %v843_v46 }
  0x75   : > { %4383 = vmatprep.subr.mxu0 %v858_v47 }
  0x76   : > { %4384 = vmatpush3.msra.mxu0 %v842_v48 }
  0x77   : > { %4385 = vmatprep.subr.mxu0 %v857_v49 }
  0x78   : > { %4386 = vmatpush3.msra.mxu0 %v841_v50 }
  0x79   : > { %4387 = vmatprep.subr.mxu0 %v856_v51 }
  0x7a   : > { %4388 = vmatpush3.msra.mxu0 %v840_v52 }
  0x7b   : > { %4389 = vmatprep.subr.mxu0 %v855_v53 }
  0x7c   : > { %4390 = vmatpush3.msra.mxu0 %v839_v54 }
  0x7d   : > { %939 = vmatmul.mubr.f32.vlgmr.msra.gmra.mxu0 %v5147_v18 }
  0xf9   : > { %v4251_v55 = vpop.f32.mrf.mxu0 }
  0xfb   : > { %v4252_v57 = vpop.f32.mrf.mxu0 }
  0xfc   : > { %v4286_v58 = vpop.f32.mrf.mxu1  ;;  %v4253_v59 = vadd.f32 %v4252_v57, %v4251_v55 }
  0xfe   : > { %v4287_v61 = vpop.f32.mrf.mxu1  ;;  %v623_v62 = vadd.f32 %v4253_v59, %v514_v60 }
  0xff   : > { %v4288_v63 = vadd.f32 %v4287_v61, %v4286_v58 }
 0x101   : > { %v693_v2 = vadd.f32 %v4288_v63, %v623_v62 }
 0x11b   : > { %v4321_v0 = vpop.f32.mrf.mxu0 }
 0x11d   : > { %v4322_v1 = vpop.f32.mrf.mxu0 }
 0x11e   : > { %v4323_v3 = vadd.f32 %v4322_v1, %v4321_v0  ;;  %v4356_v4 = vpop.f32.mrf.mxu1 }
 0x120   : > { %v763_v5 = vadd.f32 %v4323_v3, %v693_v2  ;;  %v4357_v6 = vpop.f32.mrf.mxu1 }
 0x121   : > { %v4358_v7 = vadd.f32 %v4357_v6, %v4356_v4 }
 0x123   : > { %v833_v8 = vadd.f32 %v4358_v7, %v763_v5 }
 0x125   : > { %837 = vst.msk [vmem:[%s6667_s29] sm:$0x1] %vm836_vm0, %v833_v8  ;;  %s4618_s29 = smov 8  }
 0x13d   : > { %v4391_v9 = vpop.f32.mrf.mxu0 }
 0x13f   : > { %v4392_v10 = vpop.f32.mrf.mxu0 }
 0x140   : > { %v4393_v11 = vadd.f32 %v4392_v10, %v4391_v9 }
 0x142   : > { %961 = vrot.lane.b32.xlu1 %v4393_v11, %s4604_s30  ;;  %955 = vrot.lane.b32.xlu0 %v4393_v11, %s4605_s28 }
 0x146   : > { %964 = vrot.lane.b32.xlu1 %v4393_v11, %s6675_s11  ;;  %958 = vrot.lane.b32.xlu0 %v4393_v11, %s4607_s18  ;;  %s4623_s11 = smov 56  }
 0x14a   : > { %970 = vrot.lane.b32.xlu1 %v4393_v11, %s6674_s25  ;;  %967 = vrot.lane.b32.xlu0 %v4393_v11, %s4609_s20  ;;  %s6676_s25 = smov 40  }
 0x14e   : > { %973 = vrot.lane.b32.xlu0 %v4393_v11, %s4610_s12 }
 0x1b4   : > { %v962_v13 = vpop.permute.xlu1 %961  ;;  %v956_v14 = vpop.permute.xlu0 %955 }
 0x1b5   : > { %v984_v26 = vcombine.low %v956_v14, %v962_v13 }
 0x1b7   : > { %v991_v30 = vrot.slane %v984_v26, %v5319_v25 }
 0x1b8   : > { %v965_v17 = vpop.permute.xlu1 %964  ;;  %v959_v18 = vpop.permute.xlu0 %958 }
 0x1b9   : > { %v976_v22 = vcombine.low %v4393_v11, %v959_v18 }
 0x1bb   : > { %v983_v27 = vrot.slane %v976_v22, %v5319_v25 }
 0x1bc   : > { %v971_v23 = vpop.permute.xlu1 %970  ;;  %v968_v24 = vpop.permute.xlu0 %967 }
 0x1bd   : > { %v992_v28 = vcombine.low %v965_v17, %v971_v23  ;;  %v1008_v33 = vcombine.low %v983_v27, %v991_v30  ;;  %v1009_v38 = vcombine.high %v983_v27, %v991_v30 }
 0x1bf   : > { %v999_v34 = vrot.slane %v992_v28, %v5319_v25  ;;  %v1016_v39 = vrot.slane %v1008_v33, %v5324_v32  ;;  %v1023_v44 = vrot.slane %v1009_v38, %v5324_v32 }
 0x1c0   : > { %v974_v29 = vpop.permute.xlu0 %973 }
 0x1c1   : > { %v1000_v31 = vcombine.low %v968_v24, %v974_v29 }
 0x1c3   : > { %v1007_v35 = vrot.slane %v1000_v31, %v5319_v25 }
 0x1c5   : > { %v1024_v36 = vcombine.low %v999_v34, %v1007_v35  ;;  %v1025_v37 = vcombine.high %v999_v34, %v1007_v35 }
 0x1c7   : > { %v1032_v40 = vrot.slane %v1024_v36, %v5324_v32  ;;  %v1039_v43 = vrot.slane %v1025_v37, %v5324_v32 }
 0x1c9   : > { %v1041_v41 = vcombine.high %v1016_v39, %v1032_v40  ;;  %v1040_v42 = vcombine.low %v1016_v39, %v1032_v40  ;;  %v1043_v45 = vcombine.high %v1023_v44, %v1039_v43  ;;  %v1042_v46 = vcombine.low %v1023_v44, %v1039_v43 }
 0x1cb   : > { %1050 = vrot.lane.b32.xlu0 %v1041_v41, %s6672_s21  ;;  %1048 = vrot.lane.b32.xlu1 %v1040_v42, %s6672_s21 }
 0x1cf   : > { %1054 = vrot.lane.b32.xlu0 %v1043_v45, %s6672_s21  ;;  %1052 = vrot.lane.b32.xlu1 %v1042_v46, %s6672_s21  ;;  %s4621_s21 = smov 24  }
 0x23d   : > { %v1051_v47 = vpop.permute.xlu0 %1050  ;;  %v1049_v48 = vpop.permute.xlu1 %1048 }
 0x23e   : > { %1062 = vst.msk [vmem:[#allocation2 + $0x11] sm:$0xff] %vm1060_vm3, %v1051_v47  ;;  %1061 = vst.msk [vmem:[#allocation2 + $0x1] sm:$0xff] %vm1060_vm3, %v1049_v48 }
 0x241   : > { %v1055_v49 = vpop.permute.xlu0 %1054  ;;  %v1053_v50 = vpop.permute.xlu1 %1052 }
 0x242   : > { %1064 = vst.msk [vmem:[#allocation2 + $0x31] sm:$0xff] %vm1060_vm3, %v1055_v49  ;;  %1063 = vst.msk [vmem:[#allocation2 + $0x21] sm:$0xff] %vm1060_vm3, %v1053_v50 }
 0x245   : > { %v1074_v51 = vld [vmem:[#allocation2 + $0x12] sm:$0xff]  ;;  %v1073_v52 = vld [vmem:[#allocation2 + $0x2] sm:$0xff] }
 0x246   : > { %1151 = vrot.lane.b32.xlu0 %v1074_v51, %s6670_s27  ;;  %1149 = vrot.lane.b32.xlu1 %v1073_v52, %s6670_s27  ;;  %v1070_v60 = vld [vmem:[#allocation2 + $0x11] sm:$0xff]  ;;  %v1069_v61 = vld [vmem:[#allocation2 + $0x1] sm:$0xff] }
 0x247   : > { %v1066_v14 = vld [vmem:[#allocation2 + $0x10] sm:$0xff]  ;;  %v1065_v16 = vld [vmem:[#allocation2] sm:$0xff] }
 0x249   : > { %v1076_v53 = vld [vmem:[#allocation2 + $0x32] sm:$0xff]  ;;  %v1075_v54 = vld [vmem:[#allocation2 + $0x22] sm:$0xff] }
 0x24a   : > { %v1072_v55 = vld [vmem:[#allocation2 + $0x31] sm:$0xff]  ;;  %1155 = vrot.lane.b32.xlu0 %v1076_v53, %s6670_s27  ;;  %v1585_v57 = vcombine.low %v1074_v51, %v1076_v53  ;;  %v1586_v58 = vcombine.high %v1074_v51, %v1076_v53  ;;  %1153 = vrot.lane.b32.xlu1 %v1075_v54, %s6670_s27  ;;  %v1569_v59 = vcombine.low %v1073_v52, %v1075_v54  ;;  %v1071_v62 = vld [vmem:[#allocation2 + $0x21] sm:$0xff] }
 0x24b   : > { %v1570_v63 = vcombine.high %v1073_v52, %v1075_v54  ;;  %v1345_v0 = vcombine.low %v1070_v60, %v1072_v55  ;;  %v1346_v1 = vcombine.high %v1070_v60, %v1072_v55  ;;  %v1329_v2 = vcombine.low %v1069_v61, %v1071_v62  ;;  %v1068_v3 = vld [vmem:[#allocation2 + $0x30] sm:$0xff]  ;;  %v1067_v8 = vld [vmem:[#allocation2 + $0x20] sm:$0xff] }
 0x24c   : > { %v5345_v4 = vrot.slane %v1585_v57, %v5319_v25  ;;  %v5348_v5 = vrot.slane %v1586_v58, %v5319_v25  ;;  %v5351_v6 = vrot.slane %v1569_v59, %v5319_v25  ;;  %v1330_v7 = vcombine.high %v1069_v61, %v1071_v62 }
 0x24d   : > { %v5354_v9 = vrot.slane %v1570_v63, %v5319_v25  ;;  %v5357_v10 = vrot.slane %v1345_v0, %v5319_v25  ;;  %v5360_v11 = vrot.slane %v1346_v1, %v5319_v25  ;;  %v5363_v13 = vrot.slane %v1329_v2, %v5319_v25 }
 0x24e   : > { %1139 = vrot.lane.b32.xlu0 %v1074_v51, %s6668_s22  ;;  %1137 = vrot.lane.b32.xlu1 %v1073_v52, %s6668_s22  ;;  %v5368_v15 = vrot.slane %v1330_v7, %v5319_v25  ;;  %v1177_v17 = vcombine.low %v1066_v14, %v1068_v3  ;;  %v1178_v18 = vcombine.high %v1066_v14, %v1068_v3 }
 0x24f   : > { %v1161_v19 = vcombine.low %v1065_v16, %v1067_v8  ;;  %v1162_v20 = vcombine.high %v1065_v16, %v1067_v8  ;;  %v1633_v21 = vcombine.low %v5351_v6, %v5345_v4  ;;  %v1634_v22 = vcombine.high %v5351_v6, %v5345_v4 }
 0x250   : > { %v5375_v23 = vrot.slane %v1177_v17, %v5319_v25  ;;  %v5378_v24 = vrot.slane %v1178_v18, %v5319_v25  ;;  %v1649_v26 = vcombine.low %v5354_v9, %v5348_v5  ;;  %v1393_v56 = vcombine.low %v5363_v13, %v5357_v10 }
 0x251   : > { %v5385_v27 = vrot.slane %v1161_v19, %v5319_v25  ;;  %v5388_v28 = vrot.slane %v1162_v20, %v5319_v25  ;;  %v1394_v29 = vcombine.high %v5363_v13, %v5357_v10  ;;  %v1650_v31 = vcombine.high %v5354_v9, %v5348_v5 }
 0x252   : > { %1143 = vrot.lane.b32.xlu0 %v1076_v53, %s6668_s22  ;;  %1141 = vrot.lane.b32.xlu1 %v1075_v54, %s6668_s22  ;;  %v1409_v34 = vcombine.low %v5368_v15, %v5360_v11  ;;  %v1410_v37 = vcombine.high %v5368_v15, %v5360_v11  ;;  %v5463_v20 = vrot.slane %v1633_v21, %v5324_v32 }
 0x253   : > { %v1225_v30 = vcombine.low %v5385_v27, %v5375_v23  ;;  %v1226_v33 = vcombine.high %v5385_v27, %v5375_v23  ;;  %v1241_v35 = vcombine.low %v5388_v28, %v5378_v24  ;;  %v1242_v36 = vcombine.high %v5388_v28, %v5378_v24  ;;  %v1956_v24 = vld [vmem:[%s6659_s4] sm:$0xff] }
 0x254   : > { %v1664_v10 = vrot.slane %v1650_v31, %v5324_v32  ;;  %v1417_v27 = vrot.slane %v1409_v34, %v5324_v32 }
 0x256   : > { %1111 = vrot.lane.b32.xlu0 %v1070_v60, %s6668_s22  ;;  %1109 = vrot.lane.b32.xlu1 %v1069_v61, %s6668_s22 }
 0x25a   : > { %1115 = vrot.lane.b32.xlu0 %v1072_v55, %s6668_s22  ;;  %1113 = vrot.lane.b32.xlu1 %v1071_v62, %s6668_s22 }
 0x25e   : > { %1123 = vrot.lane.b32.xlu0 %v1070_v60, %s6670_s27  ;;  %1121 = vrot.lane.b32.xlu1 %v1069_v61, %s6670_s27 }
 0x262   : > { %1127 = vrot.lane.b32.xlu0 %v1072_v55, %s6670_s27  ;;  %1125 = vrot.lane.b32.xlu1 %v1071_v62, %s6670_s27 }
 0x266   : > { %1095 = vrot.lane.b32.xlu0 %v1066_v14, %s6670_s27  ;;  %1093 = vrot.lane.b32.xlu1 %v1065_v16, %s6670_s27 }
 0x26a   : > { %1099 = vrot.lane.b32.xlu0 %v1068_v3, %s6670_s27  ;;  %1097 = vrot.lane.b32.xlu1 %v1067_v8, %s6670_s27  ;;  %s4620_s27 = smov 48  }
 0x26e   : > { %1083 = vrot.lane.b32.xlu0 %v1066_v14, %s6668_s22  ;;  %1081 = vrot.lane.b32.xlu1 %v1065_v16, %s6668_s22 }
 0x272   : > { %1087 = vrot.lane.b32.xlu0 %v1068_v3, %s6668_s22  ;;  %1085 = vrot.lane.b32.xlu1 %v1067_v8, %s6668_s22  ;;  %s6678_s22 = smov 32  }
 0x2b8   : > { %v1152_v38 = vpop.permute.xlu0 %1151  ;;  %v1150_v39 = vpop.permute.xlu1 %1149 }
 0x2bc   : > { %v1156_v40 = vpop.permute.xlu0 %1155  ;;  %v1154_v41 = vpop.permute.xlu1 %1153 }
 0x2bd   : > { %v1721_v42 = vcombine.low %v1152_v38, %v1156_v40  ;;  %v1722_v43 = vcombine.high %v1152_v38, %v1156_v40  ;;  %v1705_v44 = vcombine.low %v1150_v39, %v1154_v41  ;;  %v1706_v45 = vcombine.high %v1150_v39, %v1154_v41 }
 0x2bf   : > { %v1729_v46 = vrot.slane %v1721_v42, %v5319_v25  ;;  %v1736_v47 = vrot.slane %v1722_v43, %v5319_v25  ;;  %v1713_v48 = vrot.slane %v1705_v44, %v5319_v25  ;;  %v1720_v49 = vrot.slane %v1706_v45, %v5319_v25 }
 0x2c0   : > { %v5428_v50 = vpop.permute.xlu0 %1139  ;;  %v5430_v51 = vpop.permute.xlu1 %1137  ;;  %v1648_v44 = vrot.slane %v1634_v22, %v5324_v32 }
 0x2c1   : > { %v1737_v52 = vcombine.low %v1713_v48, %v1729_v46  ;;  %v1738_v53 = vcombine.high %v1713_v48, %v1729_v46  ;;  %v1753_v57 = vcombine.low %v1720_v49, %v1736_v47  ;;  %v1754_v2 = vcombine.high %v1720_v49, %v1736_v47 }
 0x2c3   : > { %v1752_v54 = vrot.slane %v1738_v53, %v5324_v32  ;;  %v5434_v55 = vrot.slane %v1737_v52, %v5324_v32  ;;  %v5444_v1 = vrot.slane %v1753_v57, %v5324_v32  ;;  %v5454_v16 = vrot.slane %v1754_v2, %v5324_v32 }
 0x2c4   : > { %v1144_v58 = vpop.permute.xlu0 %1143  ;;  %v1142_v59 = vpop.permute.xlu1 %1141 }
 0x2c5   : > { %v1617_v60 = vcombine.low %v5428_v50, %v1144_v58  ;;  %v1601_v61 = vcombine.low %v5430_v51, %v1142_v59  ;;  %1806 = vrot.lane.b32.xlu0 %v1752_v54, %s4617_s26  ;;  %v1769_v62 = vcombine.high %v5434_v55, %v4611_v12  ;;  %v1770_v40 = vcombine.high %v1752_v54, %v4611_v12 }
 0x2c6   : > { %v1618_v54 = vcombine.high %v5428_v50, %v1144_v58  ;;  %v1602_v4 = vcombine.high %v5430_v51, %v1142_v59 }
 0x2c7   : > { %v1625_v63 = vrot.slane %v1617_v60, %v5319_v25  ;;  %v1609_v0 = vrot.slane %v1601_v61, %v5319_v25  ;;  %1786 = vrot.lane.b32.xlu1 %v1769_v62, %s4618_s29 }
 0x2c8   : > { %v5447_v3 = vpop.permute.xlu0 %1111  ;;  %v5449_v7 = vpop.permute.xlu1 %1109  ;;  %v5494_v2 = vrot.slane %v1618_v54, %v5319_v25  ;;  %v5497_v50 = vrot.slane %v1602_v4, %v5319_v25 }
 0x2c9   : > { %v1665_v8 = vcombine.low %v1609_v0, %v1625_v63  ;;  %1846 = vrot.lane.b32.xlu0 %v5444_v1, %s6678_s22  ;;  %v1666_v14 = vcombine.high %v1609_v0, %v1625_v63 }
 0x2cb   : > { %v5457_v17 = vrot.slane %v1665_v8, %v5324_v32  ;;  %v1680_v39 = vrot.slane %v1666_v14, %v5324_v32 }
 0x2cc   : > { %v1116_v18 = vpop.permute.xlu0 %1115  ;;  %v1114_v19 = vpop.permute.xlu1 %1113 }
 0x2cd   : > { %1886 = vrot.lane.b32.xlu0 %v5454_v16, %s4620_s27  ;;  %v1698_v38 = vcombine.high %v5463_v20, %v5457_v17  ;;  %v1449_v41 = vcombine.low %v5447_v3, %v1116_v18  ;;  %v1433_v42 = vcombine.low %v5449_v7, %v1114_v19  ;;  %v1697_v45 = vcombine.low %v5463_v20, %v5457_v17 }
 0x2ce   : > { %v1699_v46 = vcombine.low %v1648_v44, %v1680_v39  ;;  %v1700_v47 = vcombine.high %v1648_v44, %v1680_v39  ;;  %v1450_v39 = vcombine.high %v5447_v3, %v1116_v18 }
 0x2cf   : > { %1784 = vrot.lane.b32.xlu1 %v1698_v38, %s4618_s29  ;;  %v1457_v48 = vrot.slane %v1449_v41, %v5319_v25  ;;  %v1441_v49 = vrot.slane %v1433_v42, %v5319_v25 }
 0x2d0   : > { %v1124_v43 = vpop.permute.xlu0 %1123  ;;  %v1122_v21 = vpop.permute.xlu1 %1121 }
 0x2d1   : > { %1826 = vrot.lane.b32.xlu0 %v1770_v40, %s4621_s21  ;;  %v1497_v61 = vcombine.low %v1441_v49, %v1457_v48  ;;  %v1498_v62 = vcombine.high %v1441_v49, %v1457_v48  ;;  %v1434_v40 = vcombine.high %v5449_v7, %v1114_v19 }
 0x2d3   : > { %1804 = vrot.lane.b32.xlu1 %v1699_v46, %s4617_s26  ;;  %v1512_v44 = vrot.slane %v1498_v62, %v5324_v32  ;;  %v5511_v46 = vrot.slane %v1497_v61, %v5324_v32 }
 0x2d4   : > { %v1128_v52 = vpop.permute.xlu0 %1127  ;;  %v1126_v53 = vpop.permute.xlu1 %1125 }
 0x2d5   : > { %v1481_v6 = vcombine.low %v1124_v43, %v1128_v52  ;;  %v1465_v22 = vcombine.low %v1122_v21, %v1126_v53  ;;  %1824 = vrot.lane.b32.xlu0 %v1700_v47, %s4621_s21  ;;  %v1482_v59 = vcombine.high %v1124_v43, %v1128_v52  ;;  %v1466_v8 = vcombine.high %v1122_v21, %v1126_v53 }
 0x2d6   : > { %v1681_v43 = vcombine.low %v5497_v50, %v5494_v2  ;;  %v5530_v52 = vrot.slane %v1450_v39, %v5319_v25  ;;  %v5533_v53 = vrot.slane %v1434_v40, %v5319_v25  ;;  %v1772_v39 = vcombine.high %v5454_v16, %v4611_v12 }
 0x2d7   : > { %v1489_v57 = vrot.slane %v1481_v6, %v5319_v25  ;;  %v1473_v60 = vrot.slane %v1465_v22, %v5319_v25  ;;  %v5520_v7 = vrot.slane %v1482_v59, %v5319_v25  ;;  %v5523_v18 = vrot.slane %v1466_v8, %v5319_v25 }
 0x2d8   : > { %v5489_v63 = vpop.permute.xlu0 %1095  ;;  %v5491_v0 = vpop.permute.xlu1 %1093  ;;  %v1771_v6 = vcombine.high %v5444_v1, %v4611_v12  ;;  %v1689_v22 = vrot.slane %v1681_v43, %v5324_v32  ;;  %v1657_v59 = vrot.slane %v1649_v26, %v5324_v32  ;;  %v5573_v16 = vrot.slane %v1393_v56, %v5324_v32 }
 0x2d9   : > { %v1529_v51 = vcombine.low %v1473_v60, %v1489_v57  ;;  %v1530_v58 = vcombine.high %v1473_v60, %v1489_v57  ;;  %v1545_v57 = vcombine.low %v5523_v18, %v5520_v7  ;;  %v1682_v56 = vcombine.high %v5497_v50, %v5494_v2 }
 0x2da   : > { %v1701_v40 = vcombine.low %v1657_v59, %v1689_v22  ;;  %v1546_v50 = vcombine.high %v5523_v18, %v5520_v7  ;;  %v1514_v13 = vcombine.high %v5533_v53, %v5530_v52 }
 0x2db   : > { %v1544_v14 = vrot.slane %v1530_v58, %v5324_v32  ;;  %v5501_v38 = vrot.slane %v1529_v51, %v5324_v32  ;;  %v1513_v51 = vcombine.low %v5533_v53, %v5530_v52 }
 0x2dc   : > { %v5505_v41 = vpop.permute.xlu0 %1099  ;;  %v5507_v42 = vpop.permute.xlu1 %1097  ;;  %v1560_v18 = vrot.slane %v1546_v50, %v5324_v32  ;;  %v1528_v31 = vrot.slane %v1514_v13, %v5324_v32 }
 0x2dd   : > { %v1313_v21 = vcombine.low %v5489_v63, %v5505_v41  ;;  %v1297_v3 = vcombine.low %v5491_v0, %v5507_v42  ;;  %v1563_v19 = vcombine.low %v1512_v44, %v1544_v14  ;;  %v1562_v47 = vcombine.high %v5511_v46, %v5501_v38 }
 0x2de   : > { %v1564_v61 = vcombine.high %v1512_v44, %v1544_v14  ;;  %v1561_v62 = vcombine.low %v5511_v46, %v5501_v38  ;;  %v1553_v44 = vrot.slane %v1545_v57, %v5324_v32  ;;  %v1521_v26 = vrot.slane %v1513_v51, %v5324_v32 }
 0x2df   : > { %v1321_v48 = vrot.slane %v1313_v21, %v5319_v25  ;;  %v1305_v49 = vrot.slane %v1297_v3, %v5319_v25  ;;  %1802 = vrot.lane.b32.xlu0 %v1563_v19, %s4617_s26  ;;  %1782 = vrot.lane.b32.xlu1 %v1562_v47, %s4618_s29 }
 0x2e0   : > { %v5537_v54 = vpop.permute.xlu0 %1083  ;;  %v5539_v4 = vpop.permute.xlu1 %1081 }
 0x2e1   : > { %v1361_v60 = vcombine.low %v1305_v49, %v1321_v48  ;;  %v1362_v47 = vcombine.high %v1305_v49, %v1321_v48  ;;  %v1314_v48 = vcombine.high %v5489_v63, %v5505_v41  ;;  %v1298_v49 = vcombine.high %v5491_v0, %v5507_v42 }
 0x2e2   : > { %v1408_v63 = vrot.slane %v1394_v29, %v5324_v32  ;;  %v1696_v0 = vrot.slane %v1682_v56, %v5324_v32  ;;  %v1240_v29 = vrot.slane %v1226_v33, %v5324_v32 }
 0x2e3   : > { %1822 = vrot.lane.b32.xlu0 %v1564_v61, %s4621_s21  ;;  %1866 = vrot.lane.b32.xlu1 %v1771_v6, %s6676_s25  ;;  %v5562_v43 = vrot.slane %v1361_v60, %v5324_v32  ;;  %v1565_v6 = vcombine.low %v1521_v26, %v1553_v44  ;;  %v5583_v61 = vrot.slane %v1225_v30, %v5324_v32 }
 0x2e4   : > { %v1088_v58 = vpop.permute.xlu0 %1087  ;;  %v1086_v1 = vpop.permute.xlu1 %1085  ;;  %v1328_v41 = vrot.slane %v1314_v48, %v5319_v25  ;;  %v1312_v42 = vrot.slane %v1298_v49, %v5319_v25  ;;  %v1703_v7 = vcombine.low %v1664_v10, %v1696_v0  ;;  %v1704_v33 = vcombine.high %v1664_v10, %v1696_v0 }
 0x2e5   : > { %v1209_v8 = vcombine.low %v5537_v54, %v1088_v58  ;;  %v1193_v14 = vcombine.low %v5539_v4, %v1086_v1  ;;  %v1426_v57 = vcombine.high %v5562_v43, %v5573_v16  ;;  %v1425_v60 = vcombine.low %v5562_v43, %v5573_v16 }
 0x2e6   : > { %v1378_v34 = vcombine.high %v1312_v42, %v1328_v41  ;;  %v1568_v49 = vcombine.high %v1528_v31, %v1560_v18 }
 0x2e7   : > { %v1217_v21 = vrot.slane %v1209_v8, %v5319_v25  ;;  %v1201_v3 = vrot.slane %v1193_v14, %v5319_v25  ;;  %1906 = vrot.lane.b32.xlu0 %v1772_v39, %s4623_s11  ;;  %1844 = vrot.lane.b32.xlu1 %v1701_v40, %s6678_s22  ;;  %v1702_v14 = vcombine.high %v1657_v59, %v1689_v22 }
 0x2e8   : > { %v1376_v39 = vrot.slane %v1362_v47, %v5324_v32  ;;  %v1566_v22 = vcombine.high %v1521_v26, %v1553_v44  ;;  %v1210_v59 = vcombine.high %v5537_v54, %v1088_v58  ;;  %v1194_v40 = vcombine.high %v5539_v4, %v1086_v1 }
 0x2e9   : > { %v1257_v19 = vcombine.low %v1201_v3, %v1217_v21  ;;  %v1258_v8 = vcombine.high %v1201_v3, %v1217_v21  ;;  %v1377_v54 = vcombine.low %v1312_v42, %v1328_v41  ;;  %v1567_v58 = vcombine.low %v1528_v31, %v1560_v18 }
 0x2ea   : > { %v1427_v21 = vcombine.low %v1376_v39, %v1408_v63  ;;  %v1224_v4 = vrot.slane %v1210_v59, %v5319_v25  ;;  %v1208_v5 = vrot.slane %v1194_v40, %v5319_v25  ;;  %v1428_v53 = vcombine.high %v1376_v39, %v1408_v63 }
 0x2eb   : > { %v5586_v51 = vrot.slane %v1257_v19, %v5324_v32  ;;  %1842 = vrot.lane.b32.xlu0 %v1565_v6, %s6678_s22  ;;  %1780 = vrot.lane.b32.xlu1 %v1426_v57, %s4618_s29  ;;  %v1272_v3 = vrot.slane %v1258_v8, %v5324_v32  ;;  %v1385_v23 = vrot.slane %v1377_v54, %v5324_v32 }
 0x2ec   : > { %v1273_v52 = vcombine.low %v1208_v5, %v1224_v4  ;;  %v1249_v26 = vrot.slane %v1241_v35, %v5324_v32  ;;  %v1274_v19 = vcombine.high %v1208_v5, %v1224_v4  ;;  %v1256_v35 = vrot.slane %v1242_v36, %v5324_v32 }
 0x2ed   : > { %v1290_v30 = vcombine.high %v5583_v61, %v5586_v51  ;;  %v1289_v2 = vcombine.low %v5583_v61, %v5586_v51  ;;  %v1291_v9 = vcombine.low %v1240_v29, %v1272_v3  ;;  %v1430_v1 = vcombine.high %v1385_v23, %v1417_v27 }
 0x2ee   : > { %v1281_v44 = vrot.slane %v1273_v52, %v5324_v32  ;;  %v1429_v47 = vcombine.low %v1385_v23, %v1417_v27  ;;  %v1292_v57 = vcombine.high %v1240_v29, %v1272_v3  ;;  %v1288_v48 = vrot.slane %v1274_v19, %v5324_v32 }
 0x2ef   : > { %1864 = vrot.lane.b32.xlu1 %v1702_v14, %s6676_s25  ;;  %1778 = vrot.lane.b32.xlu0 %v1290_v30, %s4618_s29  ;;  %v1392_v8 = vrot.slane %v1378_v34, %v5324_v32  ;;  %v1424_v14 = vrot.slane %v1410_v37, %v5324_v32  ;;  %v4625_v36 = vmov 0  }
 0x2f0   : > { %v1293_v6 = vcombine.low %v1249_v26, %v1281_v44  ;;  %v1294_v56 = vcombine.high %v1249_v26, %v1281_v44  ;;  %v1295_v30 = vcombine.low %v1256_v35, %v1288_v48  ;;  %4510 = vset.pattern.permute.xlu0 %v4625_v36  ;;  %v1296_v63 = vcombine.high %v1256_v35, %v1288_v48 }
 0x2f1   : > { %v1431_v28 = vcombine.low %v1392_v8, %v1424_v14  ;;  %v1432_v39 = vcombine.high %v1392_v8, %v1424_v14 }
 0x2f3   : > { %1800 = vrot.lane.b32.xlu1 %v1427_v21, %s4617_s26  ;;  %1862 = vrot.lane.b32.xlu0 %v1566_v22, %s6676_s25 }
 0x2f7   : > { %1884 = vrot.lane.b32.xlu1 %v1703_v7, %s4620_s27  ;;  %1798 = vrot.lane.b32.xlu0 %v1291_v9, %s4617_s26 }
 0x2fb   : > { %1820 = vrot.lane.b32.xlu1 %v1428_v53, %s4621_s21  ;;  %1882 = vrot.lane.b32.xlu0 %v1567_v58, %s4620_s27 }
 0x2ff   : > { %1904 = vrot.lane.b32.xlu1 %v1704_v33, %s4623_s11  ;;  %1860 = vrot.lane.b32.xlu0 %v1430_v1, %s6676_s25 }
 0x303   : > { %1840 = vrot.lane.b32.xlu1 %v1429_v47, %s6678_s22  ;;  %1838 = vrot.lane.b32.xlu0 %v1293_v6, %s6678_s22  ;;  %s6687_s22 = smov 80  }
 0x307   : > { %1818 = vrot.lane.b32.xlu1 %v1292_v57, %s4621_s21  ;;  %1858 = vrot.lane.b32.xlu0 %v1294_v56, %s6676_s25  ;;  %s6686_s25 = smov 96  }
 0x30b   : > { %1902 = vrot.lane.b32.xlu1 %v1568_v49, %s4623_s11  ;;  %1878 = vrot.lane.b32.xlu0 %v1295_v30, %s4620_s27 }
 0x30f   : > { %1880 = vrot.lane.b32.xlu1 %v1431_v28, %s4620_s27  ;;  %1959 = vperm.xlu0 %4510, %v1956_v24  }
 0x313   : > { %1900 = vrot.lane.b32.xlu1 %v1432_v39, %s4623_s11 }
 0x317   : > { %1898 = vrot.lane.b32.xlu1 %v1296_v63, %s4623_s11 }
 0x337   : > { %v1807_v11 = vpop.permute.xlu0 %1806 }
 0x339   : > { %v1787_v0 = vpop.permute.xlu1 %1786 }
 0x33a   : > { %v1918_v59 = vsel %vm1913_vm5, %v5434_v55, %v1787_v0 }
 0x33b   : > { %v1847_v15 = vpop.permute.xlu0 %1846  ;;  %v1924_v40 = vsel %vm1919_vm6, %v1918_v59, %v1807_v11  ;;  %v1955_v59 = vld [vmem:[%s6658_s3] sm:$0xff] }
 0x33f   : > { %v1887_v37 = vpop.permute.xlu0 %1886 }
 0x341   : > { %v1785_v50 = vpop.permute.xlu1 %1784 }
 0x342   : > { %v1917_v1 = vsel %vm1913_vm5, %v1697_v45, %v1785_v50 }
 0x343   : > { %v1827_v41 = vpop.permute.xlu0 %1826 }
 0x344   : > { %v1930_v10 = vsel %vm1925_vm7, %v1924_v40, %v1827_v41 }
 0x345   : > { %v1805_v42 = vpop.permute.xlu1 %1804  ;;  %v1936_v29 = vsel %vm1931_vm8, %v1930_v10, %v1847_v15 }
 0x346   : > { %v1923_v44 = vsel %vm1919_vm6, %v1917_v1, %v1805_v42 }
 0x347   : > { %v1825_v22 = vpop.permute.xlu0 %1824 }
 0x348   : > { %v1929_v19 = vsel %vm1925_vm7, %v1923_v44, %v1825_v22 }
 0x351   : > { %v1803_v21 = vpop.permute.xlu0 %1802  ;;  %v1783_v3 = vpop.permute.xlu1 %1782 }
 0x352   : > { %v1916_v20 = vsel %vm1913_vm5, %v1561_v62, %v1783_v3 }
 0x353   : > { %v1922_v45 = vsel %vm1919_vm6, %v1916_v20, %v1803_v21 }
 0x355   : > { %v1823_v13 = vpop.permute.xlu0 %1822  ;;  %v1867_v7 = vpop.permute.xlu1 %1866 }
 0x356   : > { %v1942_v18 = vsel %vm1937_vm9, %v1936_v29, %v1867_v7  ;;  %v1928_v30 = vsel %vm1925_vm7, %v1922_v45, %v1823_v13 }
 0x357   : > { %v1948_v54 = vsel %vm1943_vm10, %v1942_v18, %v1887_v37 }
 0x359   : > { %v1907_v55 = vpop.permute.xlu0 %1906  ;;  %v1845_v4 = vpop.permute.xlu1 %1844 }
 0x35a   : > { %v1954_v5 = vsel %vm1949_vm11, %v1948_v54, %v1907_v55  ;;  %v1935_v6 = vsel %vm1931_vm8, %v1929_v19, %v1845_v4 }
 0x35b   : > { %4411 = vmatpush3.msk.msra.mxu1 %vm1966_vm12, %v1954_v5 }
 0x35c   : > { %4412 = vmatprep.subr.mxu1 %v4611_v12 }
 0x35d   : > { %v1843_v9 = vpop.permute.xlu0 %1842  ;;  %v1781_v31 = vpop.permute.xlu1 %1780 }
 0x35e   : > { %v1934_v14 = vsel %vm1931_vm8, %v1928_v30, %v1843_v9  ;;  %v1915_v38 = vsel %vm1913_vm5, %v1425_v60, %v1781_v31 }
 0x361   : > { %v1779_v52 = vpop.permute.xlu0 %1778  ;;  %v1865_v53 = vpop.permute.xlu1 %1864 }
 0x362   : > { %v1941_v34 = vsel %vm1937_vm9, %v1935_v6, %v1865_v53  ;;  %v1914_v46 = vsel %vm1913_vm5, %v1289_v2, %v1779_v52 }
 0x365   : > { %v1863_v58 = vpop.permute.xlu0 %1862  ;;  %v1801_v23 = vpop.permute.xlu1 %1800 }
 0x366   : > { %v1940_v24 = vsel %vm1937_vm9, %v1934_v14, %v1863_v58  ;;  %v1921_v39 = vsel %vm1919_vm6, %v1915_v38, %v1801_v23 }
 0x369   : > { %v1799_v27 = vpop.permute.xlu0 %1798  ;;  %v1885_v33 = vpop.permute.xlu1 %1884 }
 0x36a   : > { %v1947_v57 = vsel %vm1943_vm10, %v1941_v34, %v1885_v33  ;;  %v1920_v63 = vsel %vm1919_vm6, %v1914_v46, %v1799_v27 }
 0x36d   : > { %v1821_v26 = vpop.permute.xlu1 %1820  ;;  %v1883_v47 = vpop.permute.xlu0 %1882 }
 0x36e   : > { %v1946_v28 = vsel %vm1943_vm10, %v1940_v24, %v1883_v47  ;;  %v1927_v11 = vsel %vm1925_vm7, %v1921_v39, %v1821_v26 }
 0x371   : > { %v1905_v56 = vpop.permute.xlu1 %1904  ;;  %v1861_v35 = vpop.permute.xlu0 %1860 }
 0x372   : > { %v1953_v48 = vsel %vm1949_vm11, %v1947_v57, %v1905_v56 }
 0x373   : > { %4413 = vmatpush3.msra.mxu1 %v1953_v48 }
 0x374   : > { %4414 = vmatprep.subr.mxu1 %v4611_v12 }
 0x375   : > { %v1841_v17 = vpop.permute.xlu1 %1840  ;;  %v1839_v8 = vpop.permute.xlu0 %1838 }
 0x376   : > { %v1933_v43 = vsel %vm1931_vm8, %v1927_v11, %v1841_v17 }
 0x377   : > { %v1939_v61 = vsel %vm1937_vm9, %v1933_v43, %v1861_v35 }
 0x379   : > { %v1819_v49 = vpop.permute.xlu1 %1818  ;;  %v1859_v15 = vpop.permute.xlu0 %1858 }
 0x37a   : > { %v1926_v37 = vsel %vm1925_vm7, %v1920_v63, %v1819_v49 }
 0x37b   : > { %v1932_v60 = vsel %vm1931_vm8, %v1926_v37, %v1839_v8 }
 0x37c   : > { %v1938_v50 = vsel %vm1937_vm9, %v1932_v60, %v1859_v15 }
 0x37d   : > { %v1903_v36 = vpop.permute.xlu1 %1902  ;;  %v1879_v0 = vpop.permute.xlu0 %1878 }
 0x37e   : > { %v1952_v62 = vsel %vm1949_vm11, %v1946_v28, %v1903_v36  ;;  %v1944_v42 = vsel %vm1943_vm10, %v1938_v50, %v1879_v0 }
 0x37f   : > { %4415 = vmatpush3.msra.mxu1 %v1952_v62 }
 0x380   : > { %4416 = vmatprep.subr.mxu1 %v4611_v12 }
 0x381   : > { %v1881_v16 = vpop.permute.xlu1 %1880 }
 0x382   : > { %v1945_v51 = vsel %vm1943_vm10, %v1939_v61, %v1881_v16 }
 0x385   : > { %v1901_v2 = vpop.permute.xlu1 %1900 }
 0x386   : > { %v1951_v41 = vsel %vm1949_vm11, %v1945_v51, %v1901_v2 }
 0x387   : > { %4417 = vmatpush3.msra.mxu1 %v1951_v41 }
 0x388   : > { %4418 = vmatprep.subr.mxu1 %v4611_v12 }
 0x389   : > { %v1899_v22 = vpop.permute.xlu1 %1898 }
 0x38a   : > { %v1950_v40 = vsel %vm1949_vm11, %v1944_v42, %v1899_v22  ;;  %v1960_v21 = vpop.permute.xlu0 %1959 }
 0x38b   : > { %4419 = vmatpush3.msra.mxu1 %v1950_v40 }
 0x38c   : > { %4421 = vmatmul.mubr.msk.f32.vlgmr.msra.gmra.mxu1 %vm1962_vm13, %v1955_v59  ;;  %4423 = vmatprep.subr.mxu1 %v4611_v12 }
 0x38d   : > { %4441 = vmatprep.mubr.msk.f32.mxu1 %vm4624_vm4, %v4611_v12 }
 0x44c   : > { %v2036_v3 = vpop.f32.mrf.mxu1 }
 0x44d   : > { %v2037_v10 = vadd.f32 %v2036_v3, %v1960_v21 }
 0x44e   : > { %v4422_v13 = vpop.f32.mrf.mxu1 }
 0x44f   : > { %v2040_v29 = vmul.f32 0.1, %v2037_v10 }
 0x451   : > { %v2041_v7 = vmax.f32 %v2037_v10, %v2040_v29 }
 0x453   : > { %2065 = vrot.lane.b32.xlu0 %v2041_v7, %s4604_s30  ;;  %2059 = vrot.lane.b32.xlu1 %v2041_v7, %s4605_s28  ;;  %s6688_s30 = smov 1   ;;  %s6689_s28 = smov 126  }
 0x457   : > { %2071 = vrot.lane.b32.xlu0 %v2041_v7, %s4609_s20  ;;  %2062 = vrot.lane.b32.xlu1 %v2041_v7, %s4607_s18  ;;  %s6690_s18 = smov 127   ;;  %s6691_s20 = smov 32  }
 0x45b   : > { %2077 = vrot.lane.b32.xlu0 %v2041_v7, %s4610_s12  ;;  %2068 = vrot.lane.b32.xlu1 %v2041_v7, %s6686_s25  ;;  %s6692_s12 = smov 40   ;;  %s6695_s25 = scalar_lea.vmem [#allocation6], %s5257_s15 }
 0x45f   : > { %2074 = vrot.lane.b32.xlu1 %v2041_v7, %s6687_s22  ;;  %s4103_s22 = sshll.u32 %s6695_s25, 4  ;;  %s4104_s22 = int_to_ptr.vmem [resolvable:$true] %s4103_s22 }
 0x4c5   : > { %v2066_v18 = vpop.permute.xlu0 %2065  ;;  %v2060_v55 = vpop.permute.xlu1 %2059 }
 0x4c6   : > { %v2096_v52 = vcombine.low %v2060_v55, %v2066_v18  ;;  %v2097_v34 = vcombine.high %v2060_v55, %v2066_v18 }
 0x4c8   : > { %v2104_v27 = vrot.slane %v2096_v52, %v5319_v25  ;;  %v2111_v30 = vrot.slane %v2097_v34, %v5319_v25 }
 0x4c9   : > { %v2072_v54 = vpop.permute.xlu0 %2071  ;;  %v2063_v4 = vpop.permute.xlu1 %2062 }
 0x4ca   : > { %v2080_v5 = vcombine.low %v2041_v7, %v2063_v4  ;;  %v2081_v44 = vcombine.high %v2041_v7, %v2063_v4 }
 0x4cc   : > { %v2088_v53 = vrot.slane %v2080_v5, %v5319_v25  ;;  %v2095_v35 = vrot.slane %v2081_v44, %v5319_v25 }
 0x4cd   : > { %v2078_v9 = vpop.permute.xlu0 %2077  ;;  %v2069_v31 = vpop.permute.xlu1 %2068 }
 0x4ce   : > { %v2128_v58 = vcombine.low %v2072_v54, %v2078_v9  ;;  %v2144_v26 = vcombine.low %v2088_v53, %v2104_v27  ;;  %v2129_v19 = vcombine.high %v2072_v54, %v2078_v9  ;;  %v2145_v17 = vcombine.high %v2088_v53, %v2104_v27 }
 0x4cf   : > { %v2160_v36 = vcombine.low %v2095_v35, %v2111_v30  ;;  %v2161_v11 = vcombine.high %v2095_v35, %v2111_v30 }
 0x4d0   : > { %v2136_v47 = vrot.slane %v2128_v58, %v5319_v25  ;;  %v2143_v20 = vrot.slane %v2129_v19, %v5319_v25  ;;  %v2152_v45 = vrot.slane %v2144_v26, %v5324_v32  ;;  %v2159_v38 = vrot.slane %v2145_v17, %v5324_v32 }
 0x4d1   : > { %v2075_v23 = vpop.permute.xlu1 %2074  ;;  %v2168_v15 = vrot.slane %v2160_v36, %v5324_v32  ;;  %v2175_v60 = vrot.slane %v2161_v11, %v5324_v32 }
 0x4d2   : > { %v2112_v33 = vcombine.low %v2069_v31, %v2075_v23  ;;  %v2113_v1 = vcombine.high %v2069_v31, %v2075_v23 }
 0x4d4   : > { %v2120_v6 = vrot.slane %v2112_v33, %v5319_v25  ;;  %v2127_v57 = vrot.slane %v2113_v1, %v5319_v25 }
 0x4d6   : > { %v2176_v56 = vcombine.low %v2120_v6, %v2136_v47  ;;  %v2177_v48 = vcombine.high %v2120_v6, %v2136_v47  ;;  %v2192_v8 = vcombine.low %v2127_v57, %v2143_v20  ;;  %v2193_v46 = vcombine.high %v2127_v57, %v2143_v20 }
 0x4d8   : > { %v2184_v49 = vrot.slane %v2176_v56, %v5324_v32  ;;  %v2191_v28 = vrot.slane %v2177_v48, %v5324_v32  ;;  %v2200_v63 = vrot.slane %v2192_v8, %v5324_v32  ;;  %v2207_v16 = vrot.slane %v2193_v46, %v5324_v32 }
 0x4da   : > { %v2209_v14 = vcombine.high %v2152_v45, %v2184_v49  ;;  %v2208_v24 = vcombine.low %v2152_v45, %v2184_v49  ;;  %v2211_v62 = vcombine.high %v2159_v38, %v2191_v28  ;;  %v2210_v39 = vcombine.low %v2159_v38, %v2191_v28 }
 0x4db   : > { %v2213_v37 = vcombine.high %v2168_v15, %v2200_v63  ;;  %v2212_v43 = vcombine.low %v2168_v15, %v2200_v63  ;;  %v2215_v61 = vcombine.high %v2175_v60, %v2207_v16  ;;  %v2214_v51 = vcombine.low %v2175_v60, %v2207_v16 }
 0x4dc   : > { %2226 = vrot.lane.b32.xlu0 %v2209_v14, %s6688_s30  ;;  %2224 = vrot.lane.b32.xlu1 %v2208_v24, %s6688_s30 }
 0x4e0   : > { %2230 = vrot.lane.b32.xlu0 %v2211_v62, %s6688_s30  ;;  %2228 = vrot.lane.b32.xlu1 %v2210_v39, %s6688_s30 }
 0x4e4   : > { %2234 = vrot.lane.b32.xlu0 %v2213_v37, %s6688_s30  ;;  %2232 = vrot.lane.b32.xlu1 %v2212_v43, %s6688_s30 }
 0x4e8   : > { %2238 = vrot.lane.b32.xlu0 %v2215_v61, %s6688_s30  ;;  %2236 = vrot.lane.b32.xlu1 %v2214_v51, %s6688_s30 }
 0x54e   : > { %v2227_v2 = vpop.permute.xlu0 %2226  ;;  %v2225_v0 = vpop.permute.xlu1 %2224 }
 0x54f   : > { %2249 = vst.msk [vmem:[#allocation3 + $0x11] sm:$0xff] %vm1060_vm3, %v2227_v2  ;;  %2248 = vst.msk [vmem:[#allocation3 + $0x1] sm:$0xff] %vm1060_vm3, %v2225_v0 }
 0x552   : > { %v2231_v50 = vpop.permute.xlu0 %2230  ;;  %v2229_v41 = vpop.permute.xlu1 %2228 }
 0x553   : > { %2251 = vst.msk [vmem:[#allocation3 + $0x31] sm:$0xff] %vm1060_vm3, %v2231_v50  ;;  %2250 = vst.msk [vmem:[#allocation3 + $0x21] sm:$0xff] %vm1060_vm3, %v2229_v41 }
 0x556   : > { %v2235_v42 = vpop.permute.xlu0 %2234  ;;  %v2233_v22 = vpop.permute.xlu1 %2232  ;;  %v2273_v59 = vld [vmem:[#allocation3 + $0x12] sm:$0xff]  ;;  %v2272_v40 = vld [vmem:[#allocation3 + $0x2] sm:$0xff] }
 0x557   : > { %2253 = vst.msk [vmem:[#allocation3 + $0x51] sm:$0xff] %vm1060_vm3, %v2235_v42  ;;  %2252 = vst.msk [vmem:[#allocation3 + $0x41] sm:$0xff] %vm1060_vm3, %v2233_v22  ;;  %2426 = vrot.lane.b32.xlu0 %v2273_v59, %s6689_s28  ;;  %2424 = vrot.lane.b32.xlu1 %v2272_v40, %s6689_s28  ;;  %v5783_v54 = vld [vmem:[#allocation3 + $0x11] sm:$0xff]  ;;  %v5788_v9 = vld [vmem:[#allocation3 + $0x1] sm:$0xff] }
 0x558   : > { %v5866_v37 = vld [vmem:[#allocation3 + $0x10] sm:$0xff]  ;;  %v5868_v43 = vld [vmem:[#allocation3] sm:$0xff] }
 0x55a   : > { %v2239_v21 = vpop.permute.xlu0 %2238  ;;  %v2237_v3 = vpop.permute.xlu1 %2236  ;;  %v5768_v10 = vld [vmem:[#allocation3 + $0x32] sm:$0xff]  ;;  %v5770_v13 = vld [vmem:[#allocation3 + $0x22] sm:$0xff] }
 0x55b   : > { %v5772_v29 = vld [vmem:[#allocation3 + $0x31] sm:$0xff]  ;;  %2255 = vst.msk [vmem:[#allocation3 + $0x71] sm:$0xff] %vm1060_vm3, %v2239_v21  ;;  %2254 = vst.msk [vmem:[#allocation3 + $0x61] sm:$0xff] %vm1060_vm3, %v2237_v3  ;;  %2430 = vrot.lane.b32.xlu0 %v5768_v10, %s6689_s28  ;;  %v3280_v7 = vcombine.low %v2273_v59, %v5768_v10  ;;  %v3281_v18 = vcombine.high %v2273_v59, %v5768_v10  ;;  %2428 = vrot.lane.b32.xlu1 %v5770_v13, %s6689_s28  ;;  %v5785_v4 = vld [vmem:[#allocation3 + $0x21] sm:$0xff] }
 0x55c   : > { %v3264_v55 = vcombine.low %v2272_v40, %v5770_v13  ;;  %v3265_v5 = vcombine.high %v2272_v40, %v5770_v13  ;;  %v2873_v31 = vcombine.high %v5783_v54, %v5772_v29  ;;  %v2857_v23 = vcombine.high %v5788_v9, %v5785_v4  ;;  %v5850_v38 = vld [vmem:[#allocation3 + $0x30] sm:$0xff]  ;;  %v5852_v46 = vld [vmem:[#allocation3 + $0x20] sm:$0xff] }
 0x55d   : > { %v3288_v52 = vrot.slane %v3280_v7, %v5319_v25  ;;  %v5794_v53 = vrot.slane %v3281_v18, %v5319_v25  ;;  %v2872_v34 = vcombine.low %v5783_v54, %v5772_v29  ;;  %v2856_v20 = vcombine.low %v5788_v9, %v5785_v4 }
 0x55e   : > { %v3272_v58 = vrot.slane %v3264_v55, %v5319_v25  ;;  %v5800_v27 = vrot.slane %v3265_v5, %v5319_v25  ;;  %v5802_v33 = vld [vmem:[#allocation3 + $0x52] sm:$0xff]  ;;  %v5804_v1 = vld [vmem:[#allocation3 + $0x42] sm:$0xff]  ;;  %v5844_v24 = vrot.slane %v2873_v31, %v5319_v25  ;;  %v5864_v15 = vrot.slane %v2857_v23, %v5319_v25 }
 0x55f   : > { %2434 = vrot.lane.b32.xlu0 %v5802_v33, %s6689_s28  ;;  %2432 = vrot.lane.b32.xlu1 %v5804_v1, %s6689_s28  ;;  %v5838_v8 = vld [vmem:[#allocation3 + $0x51] sm:$0xff]  ;;  %v5841_v14 = vrot.slane %v2872_v34, %v5319_v25  ;;  %v5846_v28 = vld [vmem:[#allocation3 + $0x41] sm:$0xff]  ;;  %v5861_v11 = vrot.slane %v2856_v20, %v5319_v25  ;;  %v2464_v51 = vcombine.low %v5866_v37, %v5850_v38 }
 0x560   : > { %v3329_v44 = vcombine.high %v3272_v58, %v3288_v52  ;;  %v3328_v26 = vcombine.low %v3272_v58, %v3288_v52  ;;  %v3344_v19 = vcombine.low %v5800_v27, %v5794_v53  ;;  %v2465_v2 = vcombine.high %v5866_v37, %v5850_v38  ;;  %v5886_v22 = vld [vmem:[#allocation3 + $0x50] sm:$0xff]  ;;  %v5904_v7 = vld [vmem:[#allocation3 + $0x40] sm:$0xff] }
 0x561   : > { %v2448_v0 = vcombine.low %v5868_v43, %v5852_v46  ;;  %v2449_v52 = vcombine.high %v5868_v43, %v5852_v46 }
 0x562   : > { %v5812_v47 = vld [vmem:[#allocation3 + $0x72] sm:$0xff]  ;;  %v5814_v6 = vld [vmem:[#allocation3 + $0x62] sm:$0xff]  ;;  %v5881_v41 = vrot.slane %v3329_v44, %v5324_v32  ;;  %v5919_v58 = vrot.slane %v3344_v19, %v5324_v32  ;;  %v3345_v44 = vcombine.high %v5800_v27, %v5794_v53 }
 0x563   : > { %2438 = vrot.lane.b32.xlu0 %v5812_v47, %s6689_s28  ;;  %v3312_v57 = vcombine.low %v5802_v33, %v5812_v47  ;;  %v3313_v56 = vcombine.high %v5802_v33, %v5812_v47  ;;  %2436 = vrot.lane.b32.xlu1 %v5814_v6, %s6689_s28  ;;  %v3296_v48 = vcombine.low %v5804_v1, %v5814_v6  ;;  %v5828_v35 = vld [vmem:[#allocation3 + $0x71] sm:$0xff]  ;;  %v5834_v45 = vld [vmem:[#allocation3 + $0x61] sm:$0xff] }
 0x564   : > { %v3297_v17 = vcombine.high %v5804_v1, %v5814_v6  ;;  %v2904_v36 = vcombine.low %v5838_v8, %v5828_v35  ;;  %v2888_v63 = vcombine.low %v5846_v28, %v5834_v45  ;;  %v5870_v16 = vld [vmem:[#allocation3 + $0x70] sm:$0xff]  ;;  %v5878_v50 = vld [vmem:[#allocation3 + $0x60] sm:$0xff]  ;;  %v5930_v34 = vrot.slane %v2448_v0, %v5319_v25 }
 0x565   : > { %v3320_v49 = vrot.slane %v3312_v57, %v5319_v25  ;;  %v3304_v30 = vrot.slane %v3296_v48, %v5319_v25  ;;  %v3327_v62 = vrot.slane %v3313_v56, %v5319_v25  ;;  %v2496_v18 = vcombine.low %v5886_v22, %v5870_v16 }
 0x566   : > { %v3311_v39 = vrot.slane %v3297_v17, %v5319_v25  ;;  %v5884_v42 = vrot.slane %v2904_v36, %v5319_v25  ;;  %v5902_v3 = vrot.slane %v2888_v63, %v5319_v25  ;;  %v2480_v5 = vcombine.low %v5904_v7, %v5878_v50 }
 0x567   : > { %2402 = vrot.lane.b32.xlu0 %v2273_v59, %s6690_s18  ;;  %2400 = vrot.lane.b32.xlu1 %v2272_v40, %s6690_s18  ;;  %v3361_v60 = vcombine.high %v3304_v30, %v3320_v49  ;;  %v3360_v61 = vcombine.low %v3304_v30, %v3320_v49  ;;  %v5892_v40 = vrot.slane %v3328_v26, %v5324_v32 }
 0x568   : > { %v3376_v55 = vcombine.low %v3311_v39, %v3327_v62  ;;  %v5927_v26 = vrot.slane %v2464_v51, %v5319_v25  ;;  %v3377_v57 = vcombine.high %v3311_v39, %v3327_v62  ;;  %v2936_v56 = vcombine.low %v5864_v15, %v5844_v24 }
 0x569   : > { %v5889_v59 = vrot.slane %v3361_v60, %v5324_v32  ;;  %v5895_v21 = vrot.slane %v3360_v61, %v5324_v32  ;;  %v2952_v19 = vcombine.low %v5902_v3, %v5884_v42  ;;  %v5945_v48 = vrot.slane %v2496_v18, %v5319_v25 }
 0x56a   : > { %v5922_v23 = vrot.slane %v3376_v55, %v5324_v32  ;;  %v5948_v17 = vrot.slane %v2480_v5, %v5319_v25  ;;  %v2497_v20 = vcombine.high %v5886_v22, %v5870_v16  ;;  %v2481_v49 = vcombine.high %v5904_v7, %v5878_v50 }
 0x56b   : > { %2406 = vrot.lane.b32.xlu0 %v5768_v10, %s6690_s18  ;;  %2404 = vrot.lane.b32.xlu1 %v5770_v13, %s6690_s18  ;;  %v3394_v31 = vcombine.low %v5881_v41, %v5889_v59  ;;  %v3393_v10 = vcombine.high %v5892_v40, %v5895_v21  ;;  %v3395_v13 = vcombine.high %v5881_v41, %v5889_v59 }
 0x56c   : > { %v3396_v53 = vcombine.low %v5919_v58, %v5922_v23  ;;  %v3397_v27 = vcombine.high %v5919_v58, %v5922_v23  ;;  %v2920_v30 = vcombine.low %v5861_v11, %v5841_v14  ;;  %v2937_v36 = vcombine.high %v5864_v15, %v5844_v24 }
 0x56d   : > { %v5973_v63 = vrot.slane %v2952_v19, %v5324_v32  ;;  %v2512_v60 = vcombine.low %v5930_v34, %v5927_v26  ;;  %v5978_v61 = vrot.slane %v2465_v2, %v5319_v25  ;;  %v2544_v51 = vcombine.low %v5948_v17, %v5945_v48 }
 0x56e   : > { %v5983_v0 = vrot.slane %v2449_v52, %v5319_v25  ;;  %v5992_v18 = vrot.slane %v2920_v30, %v5324_v32  ;;  %v3392_v5 = vcombine.low %v5892_v40, %v5895_v21 }
 0x56f   : > { %2410 = vrot.lane.b32.xlu0 %v5802_v33, %s6690_s18  ;;  %2408 = vrot.lane.b32.xlu1 %v5804_v1, %s6690_s18  ;;  %v5951_v33 = vrot.slane %v3345_v44, %v5324_v32  ;;  %v5954_v1 = vrot.slane %v3377_v57, %v5324_v32  ;;  %v5995_v55 = vrot.slane %v2512_v60, %v5324_v32 }
 0x570   : > { %v5998_v2 = vrot.slane %v2544_v51, %v5324_v32  ;;  %v2984_v52 = vcombine.low %v5992_v18, %v5973_v63  ;;  %v2529_v57 = vcombine.high %v5983_v0, %v5978_v61  ;;  %v2528_v15 = vcombine.low %v5983_v0, %v5978_v61 }
 0x571   : > { %v3398_v62 = vcombine.low %v5951_v33, %v5954_v1  ;;  %v3399_v39 = vcombine.high %v5951_v33, %v5954_v1 }
 0x572   : > { %v2576_v44 = vcombine.low %v5995_v55, %v5998_v2  ;;  %v2577_v23 = vcombine.high %v5995_v55, %v5998_v2 }
 0x573   : > { %2414 = vrot.lane.b32.xlu0 %v5812_v47, %s6690_s18  ;;  %2412 = vrot.lane.b32.xlu1 %v5814_v6, %s6690_s18  ;;  %v5986_v47 = vrot.slane %v2497_v20, %v5319_v25  ;;  %v5989_v6 = vrot.slane %v2481_v49, %v5319_v25  ;;  %v6019_v20 = vrot.slane %v2529_v57, %v5324_v32 }
 0x575   : > { %v2561_v19 = vcombine.high %v5989_v6, %v5986_v47 }
 0x577   : > { %2370 = vrot.lane.b32.xlu0 %v5783_v54, %s6689_s28  ;;  %2368 = vrot.lane.b32.xlu1 %v5788_v9, %s6689_s28  ;;  %v6022_v49 = vrot.slane %v2561_v19, %v5324_v32 }
 0x579   : > { %v2582_v30 = vcombine.low %v6019_v20, %v6022_v49  ;;  %v2583_v60 = vcombine.high %v6019_v20, %v6022_v49 }
 0x57b   : > { %2374 = vrot.lane.b32.xlu0 %v5772_v29, %s6689_s28  ;;  %2372 = vrot.lane.b32.xlu1 %v5785_v4, %s6689_s28 }
 0x57f   : > { %2378 = vrot.lane.b32.xlu0 %v5838_v8, %s6689_s28  ;;  %2376 = vrot.lane.b32.xlu1 %v5846_v28, %s6689_s28 }
 0x583   : > { %2382 = vrot.lane.b32.xlu0 %v5828_v35, %s6689_s28  ;;  %2380 = vrot.lane.b32.xlu1 %v5834_v45, %s6689_s28 }
 0x587   : > { %2346 = vrot.lane.b32.xlu0 %v5783_v54, %s6690_s18  ;;  %2344 = vrot.lane.b32.xlu1 %v5788_v9, %s6690_s18  ;;  %v2889_v54 = vcombine.high %v5846_v28, %v5834_v45  ;;  %v2921_v9 = vcombine.high %v5861_v11, %v5841_v14 }
 0x58b   : > { %2350 = vrot.lane.b32.xlu0 %v5772_v29, %s6690_s18  ;;  %2348 = vrot.lane.b32.xlu1 %v5785_v4, %s6690_s18  ;;  %v2905_v29 = vcombine.high %v5838_v8, %v5828_v35  ;;  %v2953_v4 = vcombine.high %v5902_v3, %v5884_v42  ;;  %v2545_v3 = vcombine.high %v5948_v17, %v5945_v48 }
 0x58f   : > { %2354 = vrot.lane.b32.xlu0 %v5838_v8, %s6690_s18  ;;  %2352 = vrot.lane.b32.xlu1 %v5846_v28, %s6690_s18  ;;  %v2985_v8 = vcombine.high %v5992_v18, %v5973_v63  ;;  %v2967_v28 = vrot.slane %v2953_v4, %v5324_v32 }
 0x593   : > { %2358 = vrot.lane.b32.xlu0 %v5828_v35, %s6690_s18  ;;  %2356 = vrot.lane.b32.xlu1 %v5834_v45, %s6690_s18  ;;  %v2919_v35 = vrot.slane %v2905_v29, %v5319_v25  ;;  %v2903_v45 = vrot.slane %v2889_v54, %v5319_v25 }
 0x595   : > { %v2968_v14 = vcombine.low %v2903_v45, %v2919_v35 }
 0x597   : > { %2314 = vrot.lane.b32.xlu0 %v5866_v37, %s6689_s28  ;;  %2312 = vrot.lane.b32.xlu1 %v5868_v43, %s6689_s28 }
 0x59b   : > { %2318 = vrot.lane.b32.xlu0 %v5850_v38, %s6689_s28  ;;  %2316 = vrot.lane.b32.xlu1 %v5852_v46, %s6689_s28 }
 0x59f   : > { %2322 = vrot.lane.b32.xlu0 %v5886_v22, %s6689_s28  ;;  %2320 = vrot.lane.b32.xlu1 %v5904_v7, %s6689_s28 }
 0x5a3   : > { %2326 = vrot.lane.b32.xlu0 %v5870_v16, %s6689_s28  ;;  %2324 = vrot.lane.b32.xlu1 %v5878_v50, %s6689_s28 }
 0x5a7   : > { %2290 = vrot.lane.b32.xlu0 %v5866_v37, %s6690_s18  ;;  %2288 = vrot.lane.b32.xlu1 %v5868_v43, %s6690_s18  ;;  %v2976_v37 = vrot.slane %v2968_v14, %v5324_v32  ;;  %v2944_v43 = vrot.slane %v2936_v56, %v5324_v32  ;;  %v2559_v56 = vrot.slane %v2545_v3, %v5324_v32 }
 0x5ab   : > { %2294 = vrot.lane.b32.xlu0 %v5850_v38, %s6690_s18  ;;  %2292 = vrot.lane.b32.xlu1 %v5852_v46, %s6690_s18  ;;  %v2935_v38 = vrot.slane %v2921_v9, %v5324_v32 }
 0x5ad   : > { %v2986_v46 = vcombine.low %v2935_v38, %v2967_v28  ;;  %v2987_v11 = vcombine.high %v2935_v38, %v2967_v28 }
 0x5af   : > { %2298 = vrot.lane.b32.xlu0 %v5886_v22, %s6690_s18  ;;  %2296 = vrot.lane.b32.xlu1 %v5904_v7, %s6690_s18  ;;  %v2989_v22 = vcombine.high %v2944_v43, %v2976_v37  ;;  %v2951_v7 = vrot.slane %v2937_v36, %v5324_v32  ;;  %v2536_v36 = vrot.slane %v2528_v15, %v5324_v32 }
 0x5b3   : > { %2302 = vrot.lane.b32.xlu0 %v5870_v16, %s6690_s18  ;;  %2300 = vrot.lane.b32.xlu1 %v5878_v50, %s6690_s18  ;;  %v2988_v16 = vcombine.low %v2944_v43, %v2976_v37  ;;  %v2969_v50 = vcombine.high %v2903_v45, %v2919_v35 }
 0x5b5   : > { %v2983_v59 = vrot.slane %v2969_v50, %v5324_v32 }
 0x5b7   : > { %3729 = vrot.lane.b32.xlu0 %v3394_v31, %s4617_s26  ;;  %3693 = vrot.lane.b32.xlu1 %v3393_v10, %s4618_s29  ;;  %v2513_v31 = vcombine.high %v5930_v34, %v5927_v26  ;;  %v2990_v58 = vcombine.low %v2951_v7, %v2983_v59  ;;  %v2991_v26 = vcombine.high %v2951_v7, %v2983_v59 }
 0x5b9   : > { %v2527_v24 = vrot.slane %v2513_v31, %v5324_v32 }
 0x5bb   : > { %3765 = vrot.lane.b32.xlu0 %v3395_v13, %s4621_s21  ;;  %3687 = vrot.lane.b32.xlu1 %v2985_v8, %s4618_s29  ;;  %v2578_v33 = vcombine.low %v2527_v24, %v2559_v56  ;;  %v2579_v0 = vcombine.high %v2527_v24, %v2559_v56 }
 0x5bf   : > { %3801 = vrot.lane.b32.xlu0 %v3396_v53, %s6691_s20  ;;  %3723 = vrot.lane.b32.xlu1 %v2986_v46, %s4617_s26  ;;  %v2560_v53 = vcombine.low %v5989_v6, %v5986_v47 }
 0x5c1   : > { %v2568_v1 = vrot.slane %v2560_v53, %v5324_v32 }
 0x5c3   : > { %3837 = vrot.lane.b32.xlu0 %v3397_v27, %s6692_s12  ;;  %3759 = vrot.lane.b32.xlu1 %v2987_v11, %s4621_s21  ;;  %v2580_v47 = vcombine.low %v2536_v36, %v2568_v1  ;;  %v2581_v9 = vcombine.high %v2536_v36, %v2568_v1 }
 0x5c7   : > { %3873 = vrot.lane.b32.xlu0 %v3398_v62, %s4620_s27  ;;  %3795 = vrot.lane.b32.xlu1 %v2988_v16, %s6691_s20 }
 0x5c9   : > { %v2427_v41 = vpop.permute.xlu0 %2426  ;;  %v2425_v42 = vpop.permute.xlu1 %2424 }
 0x5cb   : > { %3909 = vrot.lane.b32.xlu0 %v3399_v39, %s4623_s11  ;;  %3831 = vrot.lane.b32.xlu1 %v2989_v22, %s6692_s12 }
 0x5cd   : > { %v2431_v10 = vpop.permute.xlu0 %2430  ;;  %v2429_v13 = vpop.permute.xlu1 %2428 }
 0x5ce   : > { %v3552_v34 = vcombine.low %v2427_v41, %v2431_v10  ;;  %v3536_v27 = vcombine.low %v2425_v42, %v2429_v13  ;;  %v3553_v35 = vcombine.high %v2427_v41, %v2431_v10  ;;  %v3537_v45 = vcombine.high %v2425_v42, %v2429_v13 }
 0x5cf   : > { %3867 = vrot.lane.b32.xlu1 %v2990_v58, %s4620_s27  ;;  %3681 = vrot.lane.b32.xlu0 %v2577_v23, %s4618_s29 }
 0x5d0   : > { %v3560_v62 = vrot.slane %v3552_v34, %v5319_v25  ;;  %v3544_v39 = vrot.slane %v3536_v27, %v5319_v25  ;;  %v3567_v41 = vrot.slane %v3553_v35, %v5319_v25  ;;  %v3551_v42 = vrot.slane %v3537_v45, %v5319_v25 }
 0x5d1   : > { %v2435_v48 = vpop.permute.xlu0 %2434  ;;  %v2433_v17 = vpop.permute.xlu1 %2432 }
 0x5d2   : > { %v3600_v8 = vcombine.low %v3544_v39, %v3560_v62  ;;  %v3601_v28 = vcombine.high %v3544_v39, %v3560_v62  ;;  %v3616_v58 = vcombine.low %v3551_v42, %v3567_v41  ;;  %v3617_v35 = vcombine.high %v3551_v42, %v3567_v41 }
 0x5d3   : > { %3903 = vrot.lane.b32.xlu1 %v2991_v26, %s4623_s11  ;;  %3717 = vrot.lane.b32.xlu0 %v2578_v33, %s4617_s26 }
 0x5d4   : > { %v3615_v3 = vrot.slane %v3601_v28, %v5324_v32  ;;  %v6180_v7 = vrot.slane %v3600_v8, %v5324_v32  ;;  %v3624_v1 = vrot.slane %v3616_v58, %v5324_v32 }
 0x5d5   : > { %v2439_v51 = vpop.permute.xlu0 %2438  ;;  %v2437_v61 = vpop.permute.xlu1 %2436 }
 0x5d6   : > { %v3584_v6 = vcombine.low %v2435_v48, %v2439_v51  ;;  %v3568_v57 = vcombine.low %v2433_v17, %v2437_v61  ;;  %v3585_v19 = vcombine.high %v2435_v48, %v2439_v51  ;;  %v3569_v29 = vcombine.high %v2433_v17, %v2437_v61 }
 0x5d7   : > { %3753 = vrot.lane.b32.xlu1 %v2579_v0, %s4621_s21  ;;  %3789 = vrot.lane.b32.xlu0 %v2580_v47, %s6691_s20 }
 0x5d8   : > { %v3592_v54 = vrot.slane %v3584_v6, %v5319_v25  ;;  %v3576_v4 = vrot.slane %v3568_v57, %v5319_v25  ;;  %v3599_v37 = vrot.slane %v3585_v19, %v5319_v25  ;;  %v3583_v43 = vrot.slane %v3569_v29, %v5319_v25 }
 0x5d9   : > { %v6165_v38 = vpop.permute.xlu0 %2402  ;;  %v6167_v46 = vpop.permute.xlu1 %2400 }
 0x5da   : > { %v3632_v14 = vcombine.low %v3576_v4, %v3592_v54  ;;  %v3633_v11 = vcombine.high %v3576_v4, %v3592_v54  ;;  %v3648_v31 = vcombine.low %v3583_v43, %v3599_v37  ;;  %v3649_v19 = vcombine.high %v3583_v43, %v3599_v37 }
 0x5db   : > { %3825 = vrot.lane.b32.xlu0 %v2581_v9, %s6692_s12 }
 0x5dc   : > { %v3647_v16 = vrot.slane %v3633_v11, %v5324_v32  ;;  %v6174_v50 = vrot.slane %v3632_v14, %v5324_v32  ;;  %v6189_v26 = vrot.slane %v3648_v31, %v5324_v32  ;;  %v3663_v41 = vrot.slane %v3649_v19, %v5324_v32 }
 0x5dd   : > { %v2407_v22 = vpop.permute.xlu0 %2406  ;;  %v2405_v59 = vpop.permute.xlu1 %2404 }
 0x5de   : > { %v3666_v10 = vcombine.low %v3615_v3, %v3647_v16  ;;  %v3665_v13 = vcombine.high %v6180_v7, %v6174_v50  ;;  %v3416_v23 = vcombine.low %v6165_v38, %v2407_v22  ;;  %v3400_v56 = vcombine.low %v6167_v46, %v2405_v59 }
 0x5df   : > { %v3667_v15 = vcombine.high %v3615_v3, %v3647_v16  ;;  %v3664_v34 = vcombine.low %v6180_v7, %v6174_v50  ;;  %v3668_v39 = vcombine.low %v3624_v1, %v6189_v26  ;;  %v3417_v45 = vcombine.high %v6165_v38, %v2407_v22 }
 0x5e0   : > { %3733 = vrot.lane.b32.xlu0 %v3666_v10, %s4617_s26  ;;  %3697 = vrot.lane.b32.xlu1 %v3665_v13, %s4618_s29  ;;  %v3424_v27 = vrot.slane %v3416_v23, %v5319_v25  ;;  %v3408_v48 = vrot.slane %v3400_v56, %v5319_v25  ;;  %v3401_v14 = vcombine.high %v6167_v46, %v2405_v59 }
 0x5e1   : > { %v2411_v53 = vpop.permute.xlu0 %2410  ;;  %v2409_v24 = vpop.permute.xlu1 %2408  ;;  %v6229_v59 = vrot.slane %v3417_v45, %v5319_v25  ;;  %v3631_v3 = vrot.slane %v3617_v35, %v5324_v32 }
 0x5e2   : > { %v3464_v0 = vcombine.low %v3408_v48, %v3424_v27  ;;  %v3465_v47 = vcombine.high %v3408_v48, %v3424_v27  ;;  %v6233_v31 = vrot.slane %v3401_v14, %v5319_v25 }
 0x5e4   : > { %3769 = vrot.lane.b32.xlu0 %v3667_v15, %s4621_s21  ;;  %v3479_v37 = vrot.slane %v3465_v47, %v5324_v32  ;;  %v6217_v43 = vrot.slane %v3464_v0, %v5324_v32  ;;  %v3480_v27 = vcombine.low %v6233_v31, %v6229_v59  ;;  %v3669_v0 = vcombine.high %v3624_v1, %v6189_v26 }
 0x5e5   : > { %v2415_v17 = vpop.permute.xlu0 %2414  ;;  %v2413_v33 = vpop.permute.xlu1 %2412 }
 0x5e6   : > { %v3448_v36 = vcombine.low %v2411_v53, %v2415_v17  ;;  %v3432_v62 = vcombine.low %v2409_v24, %v2413_v33  ;;  %v3449_v4 = vcombine.high %v2411_v53, %v2415_v17  ;;  %v3433_v9 = vcombine.high %v2409_v24, %v2413_v33 }
 0x5e7   : > { %v3670_v53 = vcombine.low %v3631_v3, %v3663_v41 }
 0x5e8   : > { %v3456_v51 = vrot.slane %v3448_v36, %v5319_v25  ;;  %v3440_v61 = vrot.slane %v3432_v62, %v5319_v25  ;;  %3805 = vrot.lane.b32.xlu0 %v3668_v39, %s6691_s20  ;;  %v6221_v38 = vrot.slane %v3449_v4, %v5319_v25  ;;  %v6224_v42 = vrot.slane %v3433_v9, %v5319_v25 }
 0x5e9   : > { %v6201_v6 = vpop.permute.xlu0 %2370  ;;  %v6203_v57 = vpop.permute.xlu1 %2368  ;;  %v3488_v9 = vrot.slane %v3480_v27, %v5324_v32 }
 0x5ea   : > { %v3496_v29 = vcombine.low %v3440_v61, %v3456_v51  ;;  %v3497_v54 = vcombine.high %v3440_v61, %v3456_v51  ;;  %v3512_v56 = vcombine.low %v6224_v42, %v6221_v38  ;;  %v3671_v61 = vcombine.high %v3631_v3, %v3663_v41 }
 0x5ec   : > { %v6207_v8 = vrot.slane %v3496_v29, %v5324_v32  ;;  %v3511_v28 = vrot.slane %v3497_v54, %v5324_v32  ;;  %v3520_v51 = vrot.slane %v3512_v56, %v5324_v32 }
 0x5ed   : > { %v6211_v11 = vpop.permute.xlu0 %2374  ;;  %v6213_v16 = vpop.permute.xlu1 %2372 }
 0x5ee   : > { %v3531_v22 = vcombine.high %v3479_v37, %v3511_v28  ;;  %v3529_v46 = vcombine.high %v6217_v43, %v6207_v8  ;;  %v3144_v10 = vcombine.low %v6201_v6, %v6211_v11  ;;  %v3128_v13 = vcombine.low %v6203_v57, %v6213_v16 }
 0x5ef   : > { %v3530_v24 = vcombine.low %v3479_v37, %v3511_v28  ;;  %v3528_v15 = vcombine.low %v6217_v43, %v6207_v8  ;;  %v3532_v45 = vcombine.low %v3488_v9, %v3520_v51  ;;  %v3533_v27 = vcombine.high %v3488_v9, %v3520_v51 }
 0x5f0   : > { %3767 = vrot.lane.b32.xlu0 %v3531_v22, %s4621_s21  ;;  %3695 = vrot.lane.b32.xlu1 %v3529_v46, %s4618_s29  ;;  %v3152_v48 = vrot.slane %v3144_v10, %v5319_v25  ;;  %v3136_v17 = vrot.slane %v3128_v13, %v5319_v25 }
 0x5f1   : > { %v6241_v58 = vpop.permute.xlu0 %2378  ;;  %v6243_v23 = vpop.permute.xlu1 %2376 }
 0x5f2   : > { %v3192_v29 = vcombine.low %v3136_v17, %v3152_v48  ;;  %v3193_v22 = vcombine.high %v3136_v17, %v3152_v48  ;;  %v3481_v48 = vcombine.high %v6233_v31, %v6229_v59  ;;  %v3145_v17 = vcombine.high %v6201_v6, %v6211_v11 }
 0x5f3   : > { %v3129_v6 = vcombine.high %v6203_v57, %v6213_v16 }
 0x5f4   : > { %3877 = vrot.lane.b32.xlu0 %v3670_v53, %s4620_s27  ;;  %3731 = vrot.lane.b32.xlu1 %v3530_v24, %s4617_s26  ;;  %v6272_v26 = vrot.slane %v3192_v29, %v5324_v32  ;;  %v3513_v53 = vcombine.high %v6224_v42, %v6221_v38 }
 0x5f5   : > { %v2383_v33 = vpop.permute.xlu0 %2382  ;;  %v2381_v36 = vpop.permute.xlu1 %2380 }
 0x5f6   : > { %v3176_v62 = vcombine.low %v6241_v58, %v2383_v33  ;;  %v3160_v39 = vcombine.low %v6243_v23, %v2381_v36  ;;  %v3177_v38 = vcombine.high %v6241_v58, %v2383_v33  ;;  %v3161_v42 = vcombine.high %v6243_v23, %v2381_v36 }
 0x5f7   : > { %v3527_v59 = vrot.slane %v3513_v53, %v5324_v32  ;;  %v3495_v23 = vrot.slane %v3481_v48, %v5324_v32  ;;  %v6307_v33 = vrot.slane %v3145_v17, %v5319_v25 }
 0x5f8   : > { %v3184_v47 = vrot.slane %v3176_v62, %v5319_v25  ;;  %v3168_v19 = vrot.slane %v3160_v39, %v5319_v25  ;;  %3913 = vrot.lane.b32.xlu0 %v3671_v61, %s4623_s11  ;;  %3841 = vrot.lane.b32.xlu1 %v3669_v0, %s6692_s12  ;;  %v3207_v62 = vrot.slane %v3193_v22, %v5324_v32 }
 0x5f9   : > { %v6263_v54 = vpop.permute.xlu0 %2346  ;;  %v6265_v4 = vpop.permute.xlu1 %2344  ;;  %v3191_v36 = vrot.slane %v3177_v38, %v5319_v25  ;;  %v3175_v57 = vrot.slane %v3161_v42, %v5319_v25  ;;  %v3534_v22 = vcombine.low %v3495_v23, %v3527_v59 }
 0x5fa   : > { %v3224_v35 = vcombine.low %v3168_v19, %v3184_v47  ;;  %v3225_v37 = vcombine.high %v3168_v19, %v3184_v47 }
 0x5fc   : > { %v6269_v28 = vrot.slane %v3224_v35, %v5324_v32  ;;  %3803 = vrot.lane.b32.xlu1 %v3532_v45, %s6691_s20  ;;  %v3239_v24 = vrot.slane %v3225_v37, %v5324_v32 }
 0x5fd   : > { %v2351_v1 = vpop.permute.xlu0 %2350  ;;  %v2349_v14 = vpop.permute.xlu1 %2348 }
 0x5fe   : > { %v3257_v41 = vcombine.high %v6272_v26, %v6269_v28  ;;  %v3008_v46 = vcombine.low %v6263_v54, %v2351_v1  ;;  %v2992_v3 = vcombine.low %v6265_v4, %v2349_v14  ;;  %v3258_v31 = vcombine.low %v3207_v62, %v3239_v24 }
 0x5ff   : > { %v2993_v53 = vcombine.high %v6265_v4, %v2349_v14 }
 0x600   : > { %3691 = vrot.lane.b32.xlu1 %v3257_v41, %s4618_s29  ;;  %v3016_v39 = vrot.slane %v3008_v46, %v5319_v25  ;;  %v3000_v61 = vrot.slane %v2992_v3, %v5319_v25  ;;  %v3143_v46 = vrot.slane %v3129_v6, %v5319_v25  ;;  %v3009_v3 = vcombine.high %v6263_v54, %v2351_v1 }
 0x601   : > { %v2355_v10 = vpop.permute.xlu0 %2354  ;;  %v2353_v13 = vpop.permute.xlu1 %2352 }
 0x602   : > { %v3056_v9 = vcombine.low %v3000_v61, %v3016_v39  ;;  %v3057_v48 = vcombine.high %v3000_v61, %v3016_v39  ;;  %v3208_v14 = vcombine.low %v3143_v46, %v6307_v33  ;;  %v6336_v39 = vrot.slane %v3009_v3, %v5319_v25 }
 0x603   : > { %v6339_v61 = vrot.slane %v2993_v53, %v5319_v25  ;;  %v3241_v53 = vcombine.high %v3175_v57, %v3191_v36 }
 0x604   : > { %3839 = vrot.lane.b32.xlu1 %v3533_v27, %s6692_s12  ;;  %v6318_v17 = vrot.slane %v3056_v9, %v5324_v32 }
 0x605   : > { %v2359_v0 = vpop.permute.xlu0 %2358  ;;  %v2357_v47 = vpop.permute.xlu1 %2356  ;;  %v3073_v56 = vcombine.high %v6339_v61, %v6336_v39 }
 0x606   : > { %v3040_v51 = vcombine.low %v2355_v10, %v2359_v0  ;;  %v3024_v19 = vcombine.low %v2353_v13, %v2357_v47  ;;  %v3041_v45 = vcombine.high %v2355_v10, %v2359_v0  ;;  %v3025_v37 = vcombine.high %v2353_v13, %v2357_v47 }
 0x607   : > { %v3240_v13 = vcombine.low %v3175_v57, %v3191_v36  ;;  %v3259_v0 = vcombine.high %v3207_v62, %v3239_v24  ;;  %v3071_v24 = vrot.slane %v3057_v48, %v5324_v32 }
 0x608   : > { %v3048_v11 = vrot.slane %v3040_v51, %v5319_v25  ;;  %v3032_v29 = vrot.slane %v3024_v19, %v5319_v25  ;;  %3727 = vrot.lane.b32.xlu1 %v3258_v31, %s4617_s26  ;;  %v6326_v47 = vrot.slane %v3041_v45, %v5319_v25  ;;  %v6329_v54 = vrot.slane %v3025_v37, %v5319_v25 }
 0x609   : > { %v6301_v35 = vpop.permute.xlu0 %2314  ;;  %v6303_v58 = vpop.permute.xlu1 %2312  ;;  %v3535_v31 = vcombine.high %v3495_v23, %v3527_v59  ;;  %v3248_v6 = vrot.slane %v3240_v13, %v5324_v32  ;;  %v3072_v45 = vcombine.low %v6339_v61, %v6336_v39 }
 0x60a   : > { %v3088_v16 = vcombine.low %v3032_v29, %v3048_v11  ;;  %v3089_v41 = vcombine.high %v3032_v29, %v3048_v11  ;;  %v3104_v11 = vcombine.low %v6329_v54, %v6326_v47 }
 0x60c   : > { %v6315_v27 = vrot.slane %v3088_v16, %v5324_v32  ;;  %3875 = vrot.lane.b32.xlu1 %v3534_v22, %s4620_s27  ;;  %v3103_v4 = vrot.slane %v3089_v41, %v5324_v32  ;;  %v3216_v16 = vrot.slane %v3208_v14, %v5324_v32  ;;  %v3112_v48 = vrot.slane %v3104_v11, %v5324_v32 }
 0x60d   : > { %v6321_v38 = vpop.permute.xlu0 %2318  ;;  %v6323_v10 = vpop.permute.xlu1 %2316 }
 0x60e   : > { %v3121_v1 = vcombine.high %v6318_v17, %v6315_v27  ;;  %v2736_v62 = vcombine.low %v6301_v35, %v6321_v38  ;;  %v2720_v42 = vcombine.low %v6303_v58, %v6323_v10  ;;  %v3122_v29 = vcombine.low %v3071_v24, %v3103_v4 }
 0x60f   : > { %v3260_v13 = vcombine.low %v3216_v16, %v3248_v6 }
 0x610   : > { %3763 = vrot.lane.b32.xlu1 %v3259_v0, %s4621_s21  ;;  %3689 = vrot.lane.b32.xlu0 %v3121_v1, %s4618_s29  ;;  %v2744_v37 = vrot.slane %v2736_v62, %v5319_v25  ;;  %v2728_v41 = vrot.slane %v2720_v42, %v5319_v25  ;;  %v3123_v0 = vcombine.high %v3071_v24, %v3103_v4 }
 0x611   : > { %v6348_v51 = vpop.permute.xlu0 %2322  ;;  %v6350_v19 = vpop.permute.xlu1 %2320  ;;  %v3209_v62 = vcombine.high %v3143_v46, %v6307_v33  ;;  %v3080_v42 = vrot.slane %v3072_v45, %v5324_v32  ;;  %v3255_v4 = vrot.slane %v3241_v53, %v5324_v32  ;;  %v3261_v24 = vcombine.high %v3216_v16, %v3248_v6 }
 0x613   : > { %v3124_v11 = vcombine.low %v3080_v42, %v3112_v48  ;;  %v3223_v33 = vrot.slane %v3209_v62, %v5324_v32  ;;  %v2785_v62 = vcombine.high %v2728_v41, %v2744_v37 }
 0x614   : > { %3911 = vrot.lane.b32.xlu1 %v3535_v31, %s4623_s11  ;;  %3725 = vrot.lane.b32.xlu0 %v3122_v29, %s4617_s26  ;;  %v2784_v31 = vcombine.low %v2728_v41, %v2744_v37 }
 0x615   : > { %v6364_v59 = vpop.permute.xlu0 %2326  ;;  %v6366_v23 = vpop.permute.xlu1 %2324  ;;  %v3262_v53 = vcombine.low %v3223_v33, %v3255_v4 }
 0x616   : > { %v2768_v22 = vcombine.low %v6348_v51, %v6364_v59  ;;  %v2752_v3 = vcombine.low %v6350_v19, %v6366_v23  ;;  %v6389_v46 = vrot.slane %v2784_v31, %v5324_v32  ;;  %v2769_v39 = vcombine.high %v6348_v51, %v6364_v59 }
 0x617   : > { %v2753_v61 = vcombine.high %v6350_v19, %v6366_v23 }
 0x618   : > { %v2776_v1 = vrot.slane %v2768_v22, %v5319_v25  ;;  %v2760_v14 = vrot.slane %v2752_v3, %v5319_v25  ;;  %3799 = vrot.lane.b32.xlu1 %v3260_v13, %s6691_s20  ;;  %3761 = vrot.lane.b32.xlu0 %v3123_v0, %s4621_s21 }
 0x619   : > { %v6379_v29 = vpop.permute.xlu0 %2290  ;;  %v6381_v36 = vpop.permute.xlu1 %2288 }
 0x61a   : > { %v2816_v57 = vcombine.low %v2760_v14, %v2776_v1  ;;  %v2817_v13 = vcombine.high %v2760_v14, %v2776_v1  ;;  %v3105_v1 = vcombine.high %v6329_v54, %v6326_v47 }
 0x61c   : > { %v6385_v22 = vrot.slane %v2816_v57, %v5324_v32  ;;  %3835 = vrot.lane.b32.xlu1 %v3261_v24, %s6692_s12  ;;  %3797 = vrot.lane.b32.xlu0 %v3124_v11, %s6691_s20  ;;  %v2831_v14 = vrot.slane %v2817_v13, %v5324_v32  ;;  %v3263_v24 = vcombine.high %v3223_v33, %v3255_v4 }
 0x61d   : > { %v6393_v45 = vpop.permute.xlu0 %2294  ;;  %v6395_v3 = vpop.permute.xlu1 %2292  ;;  %v3125_v11 = vcombine.high %v3080_v42, %v3112_v48  ;;  %v3119_v48 = vrot.slane %v3105_v1, %v5324_v32  ;;  %v2737_v42 = vcombine.high %v6301_v35, %v6321_v38  ;;  %v2721_v1 = vcombine.high %v6303_v58, %v6323_v10 }
 0x61e   : > { %v2849_v6 = vcombine.high %v6389_v46, %v6385_v22  ;;  %v2600_v16 = vcombine.low %v6379_v29, %v6393_v45  ;;  %v2584_v0 = vcombine.low %v6381_v36, %v6395_v3  ;;  %v2848_v9 = vcombine.low %v6389_v46, %v6385_v22 }
 0x61f   : > { %v6431_v59 = vrot.slane %v2737_v42, %v5319_v25  ;;  %v2585_v10 = vcombine.high %v6381_v36, %v6395_v3 }
 0x620   : > { %3871 = vrot.lane.b32.xlu1 %v3262_v53, %s4620_s27  ;;  %3685 = vrot.lane.b32.xlu0 %v2849_v6, %s4618_s29  ;;  %v2608_v37 = vrot.slane %v2600_v16, %v5319_v25  ;;  %v2592_v41 = vrot.slane %v2584_v0, %v5319_v25  ;;  %v2799_v53 = vrot.slane %v2785_v62, %v5324_v32 }
 0x621   : > { %v2299_v31 = vpop.permute.xlu0 %2298  ;;  %v2297_v57 = vpop.permute.xlu1 %2296  ;;  %v3087_v6 = vrot.slane %v3073_v56, %v5324_v32 }
 0x622   : > { %v2850_v13 = vcombine.low %v2799_v53, %v2831_v14  ;;  %v2648_v16 = vcombine.low %v2592_v41, %v2608_v37 }
 0x623   : > { %v3126_v56 = vcombine.low %v3087_v6, %v3119_v48 }
 0x624   : > { %3907 = vrot.lane.b32.xlu1 %v3263_v24, %s4623_s11  ;;  %3833 = vrot.lane.b32.xlu0 %v3125_v11, %s6692_s12  ;;  %v2783_v11 = vrot.slane %v2769_v39, %v5319_v25  ;;  %v2851_v39 = vcombine.high %v2799_v53, %v2831_v14 }
 0x625   : > { %v2303_v47 = vpop.permute.xlu0 %2302  ;;  %v2301_v54 = vpop.permute.xlu1 %2300 }
 0x626   : > { %v2632_v4 = vcombine.low %v2299_v31, %v2303_v47  ;;  %v2616_v33 = vcombine.low %v2297_v57, %v2301_v54  ;;  %v2633_v35 = vcombine.high %v2299_v31, %v2303_v47  ;;  %v2617_v38 = vcombine.high %v2297_v57, %v2301_v54 }
 0x627   : > { %v2649_v31 = vcombine.high %v2592_v41, %v2608_v37  ;;  %v6444_v57 = vrot.slane %v2648_v16, %v5324_v32  ;;  %v2735_v54 = vrot.slane %v2721_v1, %v5319_v25 }
 0x628   : > { %v2640_v0 = vrot.slane %v2632_v4, %v5319_v25  ;;  %v2624_v62 = vrot.slane %v2616_v33, %v5319_v25  ;;  %3721 = vrot.lane.b32.xlu0 %v2850_v13, %s4617_s26  ;;  %v2767_v4 = vrot.slane %v2753_v61, %v5319_v25  ;;  %v2601_v33 = vcombine.high %v6379_v29, %v6393_v45 }
 0x629   : > { %v3730_v24 = vpop.permute.xlu0 %3729  ;;  %v3694_v51 = vpop.permute.xlu1 %3693  ;;  %v2647_v42 = vrot.slane %v2633_v35, %v5319_v25  ;;  %v2631_v29 = vrot.slane %v2617_v38, %v5319_v25  ;;  %v2599_v13 = vrot.slane %v2585_v10, %v5319_v25  ;;  %v2663_v16 = vrot.slane %v2649_v31, %v5324_v32 }
 0x62a   : > { %v2680_v19 = vcombine.low %v2624_v62, %v2640_v0  ;;  %v2681_v23 = vcombine.high %v2624_v62, %v2640_v0  ;;  %v3930_v58 = vsel %vm1913_vm5, %v3392_v5, %v3694_v51  ;;  %v2832_v41 = vcombine.low %v2767_v4, %v2783_v11 }
 0x62b   : > { %v3939_v21 = vsel %vm1919_vm6, %v3930_v58, %v3730_v24  ;;  %v2615_v61 = vrot.slane %v2601_v33, %v5319_v25  ;;  %v2800_v63 = vcombine.low %v2735_v54, %v6431_v59  ;;  %v2696_v62 = vcombine.low %v2631_v29, %v2647_v42 }
 0x62c   : > { %v6447_v47 = vrot.slane %v2680_v19, %v5324_v32  ;;  %3869 = vrot.lane.b32.xlu0 %v3126_v56, %s4620_s27  ;;  %v2695_v36 = vrot.slane %v2681_v23, %v5324_v32  ;;  %v2840_v25 = vrot.slane %v2832_v41, %v5324_v32  ;;  %v3127_v35 = vcombine.high %v3087_v6, %v3119_v48 }
 0x62d   : > { %v3766_v40 = vpop.permute.xlu0 %3765  ;;  %v3688_v5 = vpop.permute.xlu1 %3687  ;;  %v2664_v38 = vcombine.low %v2599_v13, %v2615_v61  ;;  %v2808_v24 = vrot.slane %v2800_v63, %v5324_v32  ;;  %v2833_v51 = vcombine.high %v2767_v4, %v2783_v11  ;;  %v2704_v56 = vrot.slane %v2696_v62, %v5324_v32 }
 0x62e   : > { %v3948_v45 = vsel %vm1925_vm7, %v3939_v21, %v3766_v40  ;;  %v3927_v3 = vsel %vm1913_vm5, %v2984_v52, %v3688_v5  ;;  %v2713_v37 = vcombine.high %v6444_v57, %v6447_v47  ;;  %v2712_v0 = vcombine.low %v6444_v57, %v6447_v47 }
 0x62f   : > { %v2714_v1 = vcombine.low %v2663_v16, %v2695_v36  ;;  %v2715_v10 = vcombine.high %v2663_v16, %v2695_v36  ;;  %v2852_v31 = vcombine.low %v2808_v24, %v2840_v25  ;;  %v2801_v48 = vcombine.high %v2735_v54, %v6431_v59 }
 0x630   : > { %3683 = vrot.lane.b32.xlu1 %v2713_v37, %s4618_s29  ;;  %3757 = vrot.lane.b32.xlu0 %v2851_v39, %s4621_s21  ;;  %v2672_v6 = vrot.slane %v2664_v38, %v5324_v32  ;;  %v2847_v11 = vrot.slane %v2833_v51, %v5324_v32  ;;  %v2697_v21 = vcombine.high %v2631_v29, %v2647_v42  ;;  %s4626_s29 = smov [#allocation6]  }
 0x631   : > { %v3802_v18 = vpop.permute.xlu0 %3801  ;;  %v3724_v52 = vpop.permute.xlu1 %3723  ;;  %v2853_v36 = vcombine.high %v2808_v24, %v2840_v25  ;;  %v2815_v37 = vrot.slane %v2801_v48, %v5324_v32  ;;  %v2665_v59 = vcombine.high %v2599_v13, %v2615_v61  ;;  %v3988_v24 = vld [vmem:[%s6661_s6] sm:$0xff] }
 0x632   : > { %v3957_v14 = vsel %vm1931_vm8, %v3948_v45, %v3802_v18  ;;  %v3936_v53 = vsel %vm1919_vm6, %v3927_v3, %v3724_v52  ;;  %v2716_v3 = vcombine.low %v2672_v6, %v2704_v56  ;;  %v2711_v39 = vrot.slane %v2697_v21, %v5324_v32 }
 0x633   : > { %v2855_v29 = vcombine.high %v2815_v37, %v2847_v11  ;;  %v2854_v63 = vcombine.low %v2815_v37, %v2847_v11  ;;  %v2679_v18 = vrot.slane %v2665_v59, %v5324_v32 }
 0x634   : > { %3719 = vrot.lane.b32.xlu1 %v2714_v1, %s4617_s26  ;;  %3905 = vrot.lane.b32.xlu0 %v3127_v35, %s4623_s11  ;;  %s4215_s26 = sshll.u32 %s4704_s17, 4 }
 0x635   : > { %v3838_v19 = vpop.permute.xlu0 %3837  ;;  %v3760_v23 = vpop.permute.xlu1 %3759  ;;  %v2719_v38 = vcombine.high %v2679_v18, %v2711_v39  ;;  %s4101_s18 = scalar_lea.hbm %s6665_s10, %s4215_s26 }
 0x636   : > { %v3966_v33 = vsel %vm1937_vm9, %v3957_v14, %v3838_v19  ;;  %v3945_v58 = vsel %vm1925_vm7, %v3936_v53, %v3760_v23  ;;  %v2718_v14 = vcombine.low %v2679_v18, %v2711_v39  ;;  %v2717_v53 = vcombine.high %v2672_v6, %v2704_v56 }
 0x638   : > { %3755 = vrot.lane.b32.xlu1 %v2715_v10, %s4621_s21  ;;  %3793 = vrot.lane.b32.xlu0 %v2852_v31, %s6691_s20  ;;  %s4516_s21 = sshll.u32 %s4626_s29, 4  ;;  %s4517_s21 = int_to_ptr.vmem [resolvable:$false] %s4516_s21 }
 0x639   : > { %v3874_v4 = vpop.permute.xlu0 %3873  ;;  %v3796_v40 = vpop.permute.xlu1 %3795  ;;  %p4519_p0 = scmp.lt.s32.totalorder %s4104_s22, %s4517_s21 }
 0x63a   : > { %v3975_v5 = vsel %vm1943_vm10, %v3966_v33, %v3874_v4  ;;  %v3954_v45 = vsel %vm1931_vm8, %v3945_v58, %v3796_v40 }
 0x63c   : > { %3791 = vrot.lane.b32.xlu1 %v2716_v3, %s6691_s20  ;;  %3829 = vrot.lane.b32.xlu0 %v2853_v36, %s6692_s12  ;;  %s4078_s20 = scalar_lea.sflag [#allocation7], %s5257_s15 }
 0x63d   : > { %v3910_v54 = vpop.permute.xlu0 %3909  ;;  %v3832_v41 = vpop.permute.xlu1 %3831 }
 0x63e   : > { %v6491_v16 = vsel %vm1949_vm11, %v3975_v5, %v3910_v54  ;;  %v3963_v42 = vsel %vm1937_vm9, %v3954_v45, %v3832_v41 }
 0x640   : > { %3901 = vrot.lane.b32.xlu1 %v2855_v29, %s4623_s11  ;;  %3865 = vrot.lane.b32.xlu0 %v2854_v63, %s4620_s27 }
 0x641   : > { %v3682_v61 = vpop.permute.xlu0 %3681  ;;  %v3868_v13 = vpop.permute.xlu1 %3867 }
 0x642   : > { %v3924_v52 = vsel %vm1913_vm5, %v2576_v44, %v3682_v61  ;;  %v3972_v62 = vsel %vm1943_vm10, %v3963_v42, %v3868_v13 }
 0x644   : > { %3863 = vrot.lane.b32.xlu1 %v2718_v14, %s4620_s27  ;;  %3827 = vrot.lane.b32.xlu0 %v2717_v53, %s6692_s12  ;;  %s4512_s12 = scalar_lea.vmem %s4104_s22, 16 }
 0x645   : > { %v3718_v32 = vpop.permute.xlu0 %3717  ;;  %v3904_v1 = vpop.permute.xlu1 %3903  ;;  %p4513_p11 = scmp.ne.s32.totalorder %s4104_s22, %s4512_s12 }
 0x646   : > { %v3933_v25 = vsel %vm1919_vm6, %v3924_v52, %v3718_v32  ;;  %v6506_v35 = vsel %vm1949_vm11, %v3972_v62, %v3904_v1  ;;  %v6693_v62 = vcombine.low %v6272_v26, %v6269_v28 }
 0x647   : > { %p4514_p12 = pnand %p4513_p11, %p4721_p5 }
 0x648   : > { %3899 = vrot.lane.b32.xlu1 %v2719_v38, %s4623_s11  ;;  %3861 = vrot.lane.b32.xlu0 %v2582_v30, %s4620_s27 }
 0x649   : > { %v3790_v55 = vpop.permute.xlu0 %3789  ;;  %v3754_v2 = vpop.permute.xlu1 %3753  ;;  %p4515_p13 = pneg %p4514_p12 }
 0x64a   : > { %v3942_v44 = vsel %vm1925_vm7, %v3933_v25, %v3754_v2 }
 0x64b   : > { %v3951_v51 = vsel %vm1931_vm8, %v3942_v44, %v3790_v55 }
 0x64c   : > { %3897 = vrot.lane.b32.xlu1 %v2583_v60, %s4623_s11  ;;  %3991 = vperm.xlu0 %4510, %v3988_v24   ;;  %s4518_s11 = scalar_lea.vmem %s4517_s21, 32 }
 0x64d   : > { %v3826_v19 = vpop.permute.xlu0 %3825  ;;  %p4520_p1 = scmp.lt.s32.totalorder %s4518_s11, %s4512_s12 }
 0x64e   : > { %v6523_v23 = vsel %vm1937_vm9, %v3951_v51, %v3826_v19  ;;  %v6694_v51 = vcombine.low %v6318_v17, %v6315_v27 }
 0x64f   : > { %p4521_p2 = por %p4520_p1, %p4519_p0 }
 0x651   : > { %p4522_p3 = pnand %p4521_p2, %p4515_p13 }
 0x652   : > { %v3734_v30 = vpop.permute.xlu0 %3733  ;;  %v3698_v33 = vpop.permute.xlu1 %3697 }
 0x653   : > { %v3932_v48 = vsel %vm1913_vm5, %v3664_v34, %v3698_v33 }
 0x654   : > { %v3941_v20 = vsel %vm1919_vm6, %v3932_v48, %v3734_v30 }
 0x656   : > { %v3770_v56 = vpop.permute.xlu0 %3769 }
 0x657   : > { %v3950_v49 = vsel %vm1925_vm7, %v3941_v20, %v3770_v56 }
 0x65a   : > { %v3806_v58 = vpop.permute.xlu0 %3805 }
 0x65b   : > { %v3959_v60 = vsel %vm1931_vm8, %v3950_v49, %v3806_v58 }
 0x662   : > { %v3768_v10 = vpop.permute.xlu0 %3767  ;;  %v3696_v31 = vpop.permute.xlu1 %3695 }
 0x663   : > { %v3931_v37 = vsel %vm1913_vm5, %v3528_v15, %v3696_v31 }
 0x666   : > { %v3878_v6 = vpop.permute.xlu0 %3877  ;;  %v3732_v11 = vpop.permute.xlu1 %3731 }
 0x667   : > { %v3940_v59 = vsel %vm1919_vm6, %v3931_v37, %v3732_v11 }
 0x668   : > { %v3949_v39 = vsel %vm1925_vm7, %v3940_v59, %v3768_v10 }
 0x66a   : > { %v3842_v4 = vpop.permute.xlu1 %3841  ;;  %v3914_v21 = vpop.permute.xlu0 %3913 }
 0x66b   : > { %v3968_v40 = vsel %vm1937_vm9, %v3959_v60, %v3842_v4 }
 0x66c   : > { %v3977_v5 = vsel %vm1943_vm10, %v3968_v40, %v3878_v6 }
 0x66d   : > { %v3986_v45 = vsel %vm1949_vm11, %v3977_v5, %v3914_v21 }
 0x66e   : > { %4424 = vmatpush3.msra.mxu1 %v3986_v45  ;;  %v3804_v50 = vpop.permute.xlu1 %3803 }
 0x66f   : > { %4425 = vmatprep.subr.mxu1 %v4611_v12  ;;  %v3958_v42 = vsel %vm1931_vm8, %v3949_v39, %v3804_v50 }
 0x672   : > { %v3692_v7 = vpop.permute.xlu1 %3691 }
 0x673   : > { %v3929_v14 = vsel %vm1913_vm5, %v6693_v62, %v3692_v7 }
 0x676   : > { %v3840_v34 = vpop.permute.xlu1 %3839 }
 0x677   : > { %v3967_v29 = vsel %vm1937_vm9, %v3958_v42, %v3840_v34  ;;  %v3987_v42 = vld [vmem:[%s6660_s5] sm:$0xff] }
 0x67a   : > { %v3728_v3 = vpop.permute.xlu1 %3727 }
 0x67b   : > { %v3938_v53 = vsel %vm1919_vm6, %v3929_v14, %v3728_v3 }
 0x67e   : > { %v3876_v36 = vpop.permute.xlu1 %3875 }
 0x67f   : > { %v3976_v63 = vsel %vm1943_vm10, %v3967_v29, %v3876_v36 }
 0x682   : > { %v3690_v54 = vpop.permute.xlu0 %3689  ;;  %v3764_v41 = vpop.permute.xlu1 %3763 }
 0x683   : > { %v3947_v25 = vsel %vm1925_vm7, %v3938_v53, %v3764_v41  ;;  %v3928_v19 = vsel %vm1913_vm5, %v6694_v51, %v3690_v54 }
 0x686   : > { %v3726_v18 = vpop.permute.xlu0 %3725  ;;  %v3912_v61 = vpop.permute.xlu1 %3911 }
 0x687   : > { %v3985_v13 = vsel %vm1949_vm11, %v3976_v63, %v3912_v61  ;;  %v3937_v56 = vsel %vm1919_vm6, %v3928_v19, %v3726_v18 }
 0x688   : > { %4426 = vmatpush3.msra.mxu1 %v3985_v13 }
 0x689   : > { %4427 = vmatprep.subr.mxu1 %v4611_v12 }
 0x68a   : > { %v3762_v8 = vpop.permute.xlu0 %3761  ;;  %4428 = vmatpush3.msra.mxu1 %v6491_v16  ;;  %v3800_v43 = vpop.permute.xlu1 %3799 }
 0x68b   : > { %4429 = vmatprep.subr.mxu1 %v4611_v12  ;;  %v3956_v38 = vsel %vm1931_vm8, %v3947_v25, %v3800_v43  ;;  %v3946_v58 = vsel %vm1925_vm7, %v3937_v56, %v3762_v8 }
 0x68e   : > { %v3798_v15 = vpop.permute.xlu0 %3797  ;;  %v3836_v52 = vpop.permute.xlu1 %3835 }
 0x68f   : > { %v3965_v16 = vsel %vm1937_vm9, %v3956_v38, %v3836_v52  ;;  %v3955_v10 = vsel %vm1931_vm8, %v3946_v58, %v3798_v15 }
 0x692   : > { %v3686_v32 = vpop.permute.xlu0 %3685  ;;  %v3872_v1 = vpop.permute.xlu1 %3871 }
 0x693   : > { %v3974_v55 = vsel %vm1943_vm10, %v3965_v16, %v3872_v1  ;;  %v3926_v60 = vsel %vm1913_vm5, %v2848_v9, %v3686_v32 }
 0x696   : > { %v3834_v2 = vpop.permute.xlu0 %3833  ;;  %v3908_v44 = vpop.permute.xlu1 %3907 }
 0x697   : > { %v3983_v24 = vsel %vm1949_vm11, %v3974_v55, %v3908_v44  ;;  %v3964_v31 = vsel %vm1937_vm9, %v3955_v10, %v3834_v2 }
 0x698   : > { %4430 = vmatpush3.msra.mxu1 %v3983_v24 }
 0x699   : > { %4431 = vmatprep.subr.mxu1 %v4611_v12 }
 0x69a   : > { %v3722_v28 = vpop.permute.xlu0 %3721 }
 0x69b   : > { %v3935_v40 = vsel %vm1919_vm6, %v3926_v60, %v3722_v28 }
 0x69e   : > { %v3870_v26 = vpop.permute.xlu0 %3869 }
 0x69f   : > { %v3973_v6 = vsel %vm1943_vm10, %v3964_v31, %v3870_v26 }
 0x6a2   : > { %v3684_v30 = vpop.permute.xlu1 %3683  ;;  %v3758_v33 = vpop.permute.xlu0 %3757 }
 0x6a3   : > { %v3944_v21 = vsel %vm1925_vm7, %v3935_v40, %v3758_v33 }
 0x6a6   : > { %v3720_v48 = vpop.permute.xlu1 %3719  ;;  %v3906_v11 = vpop.permute.xlu0 %3905 }
 0x6a7   : > { %v3982_v20 = vsel %vm1949_vm11, %v3973_v6, %v3906_v11 }
 0x6a8   : > { %4432 = vmatpush3.msra.mxu1 %v3982_v20 }
 0x6a9   : > { %4433 = vmatprep.subr.mxu1 %v4611_v12 }
 0x6aa   : > { %v3756_v27 = vpop.permute.xlu1 %3755  ;;  %v3794_v17 = vpop.permute.xlu0 %3793  ;;  %4434 = vmatpush3.msra.mxu1 %v6506_v35  ;;  %v3925_v35 = vsel %vm1913_vm5, %v2712_v0, %v3684_v30 }
 0x6ab   : > { %4435 = vmatprep.subr.mxu1 %v4611_v12  ;;  %v3953_v5 = vsel %vm1931_vm8, %v3944_v21, %v3794_v17  ;;  %v3934_v9 = vsel %vm1919_vm6, %v3925_v35, %v3720_v48 }
 0x6ac   : > { %v3943_v34 = vsel %vm1925_vm7, %v3934_v9, %v3756_v27 }
 0x6ae   : > { %v3792_v49 = vpop.permute.xlu1 %3791  ;;  %v3830_v4 = vpop.permute.xlu0 %3829 }
 0x6af   : > { %v3962_v50 = vsel %vm1937_vm9, %v3953_v5, %v3830_v4  ;;  %v3952_v36 = vsel %vm1931_vm8, %v3943_v34, %v3792_v49 }
 0x6b2   : > { %v3902_v45 = vpop.permute.xlu1 %3901  ;;  %v3866_v7 = vpop.permute.xlu0 %3865 }
 0x6b3   : > { %v3971_v22 = vsel %vm1943_vm10, %v3962_v50, %v3866_v7 }
 0x6b4   : > { %v3980_v46 = vsel %vm1949_vm11, %v3971_v22, %v3902_v45 }
 0x6b5   : > { %4436 = vmatpush3.msra.mxu1 %v3980_v46 }
 0x6b6   : > { %v3864_v3 = vpop.permute.xlu1 %3863  ;;  %v3828_v37 = vpop.permute.xlu0 %3827  ;;  %4437 = vmatprep.subr.mxu1 %v4611_v12 }
 0x6b7   : > { %v3961_v57 = vsel %vm1937_vm9, %v3952_v36, %v3828_v37 }
 0x6b8   : > { %v3970_v47 = vsel %vm1943_vm10, %v3961_v57, %v3864_v3 }
 0x6ba   : > { %v3900_v0 = vpop.permute.xlu1 %3899  ;;  %v3862_v59 = vpop.permute.xlu0 %3861 }
 0x6bb   : > { %v3979_v54 = vsel %vm1949_vm11, %v3970_v47, %v3900_v0  ;;  %v3969_v41 = vsel %vm1943_vm10, %v6523_v23, %v3862_v59 }
 0x6bc   : > { %4438 = vmatpush3.msra.mxu1 %v3979_v54 }
 0x6bd   : > { %4439 = vmatprep.subr.mxu1 %v4611_v12 }
 0x6be   : > { %v3898_v39 = vpop.permute.xlu1 %3897 }
 0x6bf   : > { %v3978_v29 = vsel %vm1949_vm11, %v3969_v41, %v3898_v39 }
 0x6c0   : > { %4440 = vmatpush3.msra.mxu1 %v3978_v29 }
 0x6c1   : > { %4442 = vmatmul.mubr.msk.f32.vlgmr.msra.gmra.mxu1 %vm3994_vm14, %v3987_v42 }
 0x6c2   : > { %4525 = shalt.err (!%p4522_p3)
}
 0x6c3   : > { %s4526_s27 = scalar_lea.hbm %s4101_s18, 16  ;;  %s4530_s30 = scalar_lea.hbm %s6665_s10, 32 }
 0x6c4   : > { %p4527_p4 = scmp.ne.s32.totalorder %s4101_s18, %s4526_s27  ;;  %p4531_p9 = scmp.lt.s32.totalorder %s4101_s18, %s6665_s10 }
 0x6c5   : > { %p4532_p10 = scmp.lt.s32.totalorder %s4530_s30, %s4526_s27 }
 0x6c6   : > { %p4528_p7 = pnand %p4527_p4, %p4721_p5 }
 0x6c7   : > { %p4533_p11 = por %p4532_p10, %p4531_p9 }
 0x6c8   : > { %p4529_p8 = pneg %p4528_p7 }
 0x6ca   : > { %p4534_p12 = pnand %p4533_p11, %p4529_p8 }
 0x6cc   : > { %4537 = shalt.err (!%p4534_p12)
}
 0x6cd   : > { %4445 = dma.vmem_to_hbm [thread:$0]  (%p4721_p5), %s4104_s22, 16, %s4101_s18, %s4078_s20   ;;  %v3992_v12 = vpop.permute.xlu0 %3991  ;;  %vm4070_vm15 = vcmask 523264  }
 0x6ce   : > { %s4206_s12 = sshll.u32 %s5257_s15, 3  ;;  %s4214_s29 = sshll.u32 %s4704_s17, 7 }
 0x6cf   : > { %s369_s21 = scalar_lea.vmem [#allocation4], %s4206_s12  ;;  %s4088_s26 = scalar_lea.hbm %s6664_s9, %s4214_s29 }
 0x6d0   : > { %s4090_s0 = sshll.u32 %s369_s21, 4  ;;  %s4073_s25 = scalar_lea.sflag [#allocation5], %s5257_s15  ;;  %s4091_s0 = int_to_ptr.vmem [resolvable:$true] %s4090_s0 }
 0x6d1   : > { %s4538_s22 = scalar_lea.vmem %s4091_s0, 128  ;;  %s4627_s18 = smov [#allocation4]  }
 0x6d2   : > { %p4539_p13 = scmp.ne.s32.totalorder %s4091_s0, %s4538_s22  ;;  %s4542_s20 = sshll.u32 %s4627_s18, 4  ;;  %s4543_s20 = int_to_ptr.vmem [resolvable:$false] %s4542_s20 }
 0x6d3   : > { %s4544_s17 = scalar_lea.vmem %s4543_s20, 256  ;;  %p4545_p2 = scmp.lt.s32.totalorder %s4091_s0, %s4543_s20 }
 0x6d4   : > { %p4540_p0 = pnand %p4539_p13, %p4721_p5  ;;  %p4546_p3 = scmp.lt.s32.totalorder %s4544_s17, %s4538_s22 }
 0x6d6   : > { %p4541_p1 = pneg %p4540_p0  ;;  %p4547_p4 = por %p4546_p3, %p4545_p2 }
 0x6d8   : > { %p4548_p7 = pnand %p4547_p4, %p4541_p1 }
 0x781   : > { %v4064_v23 = vpop.f32.mrf.mxu1 }
 0x782   : > { %v4065_v63 = vadd.f32 %v4064_v23, %v3992_v12 }
 0x783   : > { %v4443_v18 = vpop.f32.mrf.mxu1 }
 0x784   : > { %v4068_v61 = vmul.f32 0.1, %v4065_v63 }
 0x786   : > { %v4069_v13 = vmax.f32 %v4065_v63, %v4068_v61 }
 0x788   : > { %4071 = vst.msk [vmem:[%s369_s21] sm:$0xff] %vm4070_vm15, %v4069_v13 }
 0x789   : > { %4551 = shalt.err (!%p4548_p7)
}
 0x78a   : > { %s4552_s30 = scalar_lea.hbm %s4088_s26, 128  ;;  %s4556_s12 = scalar_lea.hbm %s6664_s9, 256 }
 0x78b   : > { %p4553_p8 = scmp.ne.s32.totalorder %s4088_s26, %s4552_s30  ;;  %p4557_p11 = scmp.lt.s32.totalorder %s4088_s26, %s6664_s9 }
 0x78c   : > { %p4558_p12 = scmp.lt.s32.totalorder %s4556_s12, %s4552_s30 }
 0x78d   : > { %p4554_p9 = pnand %p4553_p8, %p4721_p5 }
 0x78e   : > { %p4559_p13 = por %p4558_p12, %p4557_p11 }
 0x78f   : > { %p4555_p10 = pneg %p4554_p9 }
 0x791   : > { %p4560_p0 = pnand %p4559_p13, %p4555_p10 }
 0x793   : > { %4563 = shalt.err (!%p4560_p0)
}
 0x794   : > { %4444 = dma.vmem_to_hbm [thread:$0]  (%p4721_p5), %s4091_s0, 128, %s4088_s26, %s4073_s25  }
 0x795 PF: > { %p4455_p1 = scmp.ge.s32.totalorder %s4602_s16, 2  ;;  %s4115_s11 = sand.u32 1, %s4590_s13  }
 0x796   : > { %s4116_s27 = scalar_lea.sflag [#allocation5], %s4115_s11 }
 0x797   : > { %p4449_p2 = pnand %p4455_p1, %p4725_p6 }
 0x799   : > { %p4450_p3 = pneg %p4449_p2 }
 0x79b   : > { %4581 = dma.done.wait (%p4450_p3), %s4116_s27, 128  }
 0x79c   : > { %4583 = vsyncadd (%p4450_p3), %s4116_s27, 4294967168  ;;  %s4125_s22 = scalar_lea.sflag [#allocation7], %s4115_s11 }
 0x79d   : > { %4585 = dma.done.wait (%p4450_p3), %s4125_s22, 16  }
 0x79e   : > { %4587 = vsyncadd (%p4450_p3), %s4125_s22, 4294967280  ;;  %s6696_s18 = sld [smem:[#allocation10_spill]]  ;;  %p24_p5 = scmp.ge.s32.totalorder %s4708_s19, 4  }
 0x79f   : > { %s6697_s15 = sld [smem:[#allocation11_spill]]  ;;  %s6698_s13 = smov %s4594_s14 }
 0x7a0   : > { %s6700_s16 = smov %s4708_s19  ;;  %26 = sbr.rel (!%p24_p5) target bundleno = 7 (0x7), region = 111 }
 0x7a4   : > { %s6699_s14 = smov %s6696_s18 }
 0x7a5   :  { %4129 = vsyncpa [#allocation5], 1 }
 0x7a6   :  { %4131 = vsyncpa [#allocation5 + $0x1], 1 }
 0x7a7   :  { %4132 = vsyncpa [#allocation7], 1 }
 0x7a8   :  { %4134 = vsyncpa [#allocation7 + $0x1], 1 }

</bundles_post_ra>
